<compile_context>
chip_gen: v6e
topology: v6e:2x2x1
jax: 0.10.0
libtpu: 0.0.40
codegen_flags: <defaults>
</compile_context>

<pallas_src>
import jax
import jax.numpy as jnp
from jax import lax
from jax.experimental import pallas as pl
from jax.experimental.pallas import tpu as pltpu


def _leaky(x):
    return jnp.where(x > 0, x, 0.1 * x)


def _shift_rows_down(a):
    # out[i] = a[i-1]; out[0] = 0   (vertical tap dy = -1, zero padded)
    rolled = pltpu.roll(a, shift=1, axis=0)
    row = lax.broadcasted_iota(jnp.int32, a.shape, 0)
    return jnp.where(row >= 1, rolled, 0.0)


def _shift_rows_up(a):
    # out[i] = a[i+1]; out[H-1] = 0 (vertical tap dy = +1, zero padded)
    h = a.shape[0]
    rolled = pltpu.roll(a, shift=h - 1, axis=0)
    row = lax.broadcasted_iota(jnp.int32, a.shape, 0)
    return jnp.where(row < h - 1, rolled, 0.0)


def rcab_kernel(x_ref, band1_ref, b1_ref, band2_ref, b2_ref,
                wd1t_ref, bd1_ref, wd2f_ref, bd2f_ref, out_ref):
    # x_ref    : (1, H, W*C)   lane-dense input slab
    # band1/2  : (3*W*C, W*C)  block-banded conv weights (see _band_weight)
    # b1/b2    : (1, W*C)      conv biases tiled along W
    # wd1t     : (4, W*C)      CALayer squeeze weight^T, tiled along W, pre-scaled 1/(H*W)
    # bd1      : (4, 1)
    # wd2f     : (4, W*C)      CALayer excite weight tiled along W
    # bd2f     : (1, W*C)
    # out_ref  : (1, H, W*C)
    x = x_ref[0]                                               # (H, WC) f32

    # ---- conv1 (3x3, pad 1) + bias + LeakyReLU(0.1): one K=3*W*C matmul ----
    xcat = jnp.concatenate(
        [_shift_rows_down(x), x, _shift_rows_up(x)], axis=1)   # (H, 3*WC)
    h = jnp.dot(xcat, band1_ref[...], preferred_element_type=jnp.float32)
    h = _leaky(h + b1_ref[...])                                # (H, WC)

    # ---- conv2 (3x3, pad 1) + bias: one K=3*W*C matmul ----
    hcat = jnp.concatenate(
        [_shift_rows_down(h), h, _shift_rows_up(h)], axis=1)   # (H, 3*WC)
    h2 = jnp.dot(hcat, band2_ref[...], preferred_element_type=jnp.float32)
    h2 = h2 + b2_ref[...]                                      # (H, WC)

    # ---- CALayer: GAP -> 1x1 -> LeakyReLU(0.1) -> 1x1 -> sigmoid (VPU/XLU/EUP only) ----
    col_sum = jnp.sum(h2, axis=0, keepdims=True)               # (1, WC) sublane reduce
    y1 = jnp.sum(col_sum * wd1t_ref[...], axis=1, keepdims=True) + bd1_ref[...]
    y1 = _leaky(y1)                                            # (4, 1)
    gate = jax.nn.sigmoid(
        jnp.sum(y1 * wd2f_ref[...], axis=0, keepdims=True) + bd2f_ref[...])
    # gate: (1, WC) = per-channel attention already tiled into lane layout

    # ---- channel re-scale + residual add (lane-dense store) ----
    out_ref[0] = (h2 * gate + x).astype(out_ref.dtype)


def _band_weight(w_hwio, W):
    """(3, 3, Cin, Cout) HWIO conv kernel -> (3*W*Cin, W*Cout) block-banded matrix.

    With xcat[i] = concat(x[i-1], x[i], x[i+1]) flattened as (3, W, Cin) on the
    lane axis, xcat @ band == 3x3 conv with zero padding (the band's zero
    entries implement the W-direction padding).
    """
    C = w_hwio.shape[2]
    jo = jnp.arange(W)
    ji = jnp.arange(W)
    dx = ji[:, None] - jo[None, :] + 1                         # (W_in, W_out)
    valid = (dx >= 0) & (dx <= 2)
    w_sel = w_hwio[:, jnp.clip(dx, 0, 2), :, :]                # (3, W_in, W_out, Cin, Cout)
    w_sel = jnp.where(valid[None, :, :, None, None], w_sel, 0.0)
    band = jnp.transpose(w_sel, (0, 1, 3, 2, 4))               # (3, W_in, Cin, W_out, Cout)
    return band.reshape(3 * W * C, W * C)


def prepare_rcab_params(w1, b1, w2, b2, wd1, bd1, wd2, bd2, H, W):
    """One-time weight preprocessing (amortized across calls in real use)."""
    C = b1.shape[0]
    band1 = _band_weight(w1, W)                                # (3*W*C, W*C)
    band2 = _band_weight(w2, W)
    b1f = jnp.tile(b1.reshape(1, C), (1, W))                   # (1, W*C)
    b2f = jnp.tile(b2.reshape(1, C), (1, W))
    wd1t = jnp.tile(wd1.T, (1, W)) / float(H * W)              # (4, W*C) incl. mean
    bd1c = bd1.reshape(4, 1)                                   # (4, 1)
    wd2f = jnp.tile(wd2, (1, W))                               # (4, W*C)
    bd2f = jnp.tile(bd2.reshape(1, C), (1, W))                 # (1, W*C)
    return band1, b1f, band2, b2f, wd1t, bd1c, wd2f, bd2f


@jax.jit
def rcab_pallas(x, band1, b1f, band2, b2f, wd1t, bd1c, wd2f, bd2f):
    """x: (B, H, W, C) float32 (NHWC). W*C should be a multiple of 128 for
    fully lane-dense loads/stores (256 here)."""
    B, H, W, C = x.shape
    WC = W * C
    x2 = x.reshape(B, H, WC)                                   # free reshape (contiguous)

    def full2d(arr):
        return pl.BlockSpec(arr.shape, lambda b: (0, 0))

    out = pl.pallas_call(
        rcab_kernel,
        out_shape=jax.ShapeDtypeStruct((B, H, WC), jnp.float32),
        grid_spec=pltpu.PrefetchScalarGridSpec(
            num_scalar_prefetch=0,
            grid=(B,),
            in_specs=[
                pl.BlockSpec((1, H, WC), lambda b: (b, 0, 0)),
                full2d(band1), full2d(b1f),
                full2d(band2), full2d(b2f),
                full2d(wd1t), full2d(bd1c), full2d(wd2f), full2d(bd2f),
            ],
            out_specs=pl.BlockSpec((1, H, WC), lambda b: (b, 0, 0)),
        ),
        compiler_params=pltpu.CompilerParams(
            dimension_semantics=("parallel",)),
    )(x2, band1, b1f, band2, b2f, wd1t, bd1c, wd2f, bd2f)
    return out.reshape(B, H, W, C)


def rcab_reference(x, w1, b1, w2, b2, wd1, bd1, wd2, bd2):
    """Pure-JAX reference (NHWC / HWIO)."""
    dn = ("NHWC", "HWIO", "NHWC")
    h = lax.conv_general_dilated(x, w1, (1, 1), "SAME", dimension_numbers=dn) + b1
    h = _leaky(h)
    h = lax.conv_general_dilated(h, w2, (1, 1), "SAME", dimension_numbers=dn) + b2
    p = jnp.mean(h, axis=(1, 2), keepdims=True)                # (B,1,1,C)
    y = jnp.einsum("bijc,cd->bijd", p, wd1) + bd1
    y = _leaky(y)
    y = jnp.einsum("bijd,dc->bijc", y, wd2) + bd2
    y = jax.nn.sigmoid(y)
    return h * y + x


if __name__ == "__main__":
    B, H, W, C = 2, 16, 16, 16   # n_feat = 16; W*C = 256 (lane dense)
    key = jax.random.PRNGKey(0)
    ks = jax.random.split(key, 9)

    x = jax.random.normal(ks[0], (B, H, W, C), jnp.float32)

    # Conv weights stored HWIO (3,3,Cin,Cout); 1x1 CALayer convs as plain matrices.
    w1 = jax.random.normal(ks[1], (3, 3, C, C), jnp.float32) * 0.1
    b1 = jax.random.normal(ks[2], (C,), jnp.float32) * 0.05
    w2 = jax.random.normal(ks[3], (3, 3, C, C), jnp.float32) * 0.1
    b2 = jax.random.normal(ks[4], (C,), jnp.float32) * 0.05
    wd1 = jax.random.normal(ks[5], (C, 4), jnp.float32) * 0.2
    bd1 = jax.random.normal(ks[6], (4,), jnp.float32) * 0.05
    wd2 = jax.random.normal(ks[7], (4, C), jnp.float32) * 0.2
    bd2 = jax.random.normal(ks[8], (C,), jnp.float32) * 0.05

    params = prepare_rcab_params(w1, b1, w2, b2, wd1, bd1, wd2, bd2, H, W)

    out = rcab_pallas(x, *params)
    out = jax.block_until_ready(out)

    ref = rcab_reference(x, w1, b1, w2, b2, wd1, bd1, wd2, bd2)
    assert out.shape == (B, H, W, C)
    assert jnp.allclose(out, ref, rtol=1e-4, atol=1e-4), (
        f"max abs err {jnp.max(jnp.abs(out - ref))}")

    print("KERNEL_OK")
</pallas_src>

<mosaic_0001>
module attributes {stable_mosaic.version = 11 : i64} {
  func.func @rcab_kernel(%arg0: i32, %arg1: memref<1x16x256xf32, #tpu.memory_space<vmem>>, %arg2: memref<768x256xf32, #tpu.memory_space<vmem>>, %arg3: memref<1x256xf32, #tpu.memory_space<vmem>>, %arg4: memref<768x256xf32, #tpu.memory_space<vmem>>, %arg5: memref<1x256xf32, #tpu.memory_space<vmem>>, %arg6: memref<4x256xf32, #tpu.memory_space<vmem>>, %arg7: memref<4x1xf32, #tpu.memory_space<vmem>>, %arg8: memref<4x256xf32, #tpu.memory_space<vmem>>, %arg9: memref<1x256xf32, #tpu.memory_space<vmem>>, %arg10: memref<1x16x256xf32, #tpu.memory_space<vmem>>) attributes {dimension_semantics = [#tpu.dimension_semantics<parallel>], iteration_bounds = array<i64: 2>, scalar_prefetch = 0 : i64, scratch_operands = 0 : i64, tpu.core_type = #tpu.core_type<tc>, window_params = [{transform_indices = @transform_0, window_bounds = array<i64: 1, 16, 256>}, {pipeline_mode = #tpu.pipeline_mode<synchronous>, transform_indices = @transform_1, window_bounds = array<i64: 768, 256>}, {pipeline_mode = #tpu.pipeline_mode<synchronous>, transform_indices = @transform_2, window_bounds = array<i64: 1, 256>}, {pipeline_mode = #tpu.pipeline_mode<synchronous>, transform_indices = @transform_3, window_bounds = array<i64: 768, 256>}, {pipeline_mode = #tpu.pipeline_mode<synchronous>, transform_indices = @transform_4, window_bounds = array<i64: 1, 256>}, {pipeline_mode = #tpu.pipeline_mode<synchronous>, transform_indices = @transform_5, window_bounds = array<i64: 4, 256>}, {pipeline_mode = #tpu.pipeline_mode<synchronous>, transform_indices = @transform_6, window_bounds = array<i64: 4, 1>}, {pipeline_mode = #tpu.pipeline_mode<synchronous>, transform_indices = @transform_7, window_bounds = array<i64: 4, 256>}, {pipeline_mode = #tpu.pipeline_mode<synchronous>, transform_indices = @transform_8, window_bounds = array<i64: 1, 256>}, {transform_indices = @transform_9, window_bounds = array<i64: 1, 16, 256>}]} {
    %c0 = arith.constant 0 : index
    %c0_0 = arith.constant 0 : index
    %c0_1 = arith.constant 0 : index
    %0 = vector.load %arg1[%c0, %c0_0, %c0_1] : memref<1x16x256xf32, #tpu.memory_space<vmem>>, vector<1x16x256xf32>
    %1 = vector.shape_cast %0 : vector<1x16x256xf32> to vector<16x256xf32>
    %c1_i32 = arith.constant 1 : i32
    %2 = tpu.dynamic_rotate %1 by %c1_i32 dim 0 : vector<16x256xf32>, i32 -> vector<16x256xf32>
    %3 = tpu.iota {dimensions = array<i32: 0>} : vector<16x256xi32>
    %c1_i32_2 = arith.constant 1 : i32
    %4 = vector.broadcast %c1_i32_2 : i32 to vector<16x256xi32>
    %5 = arith.cmpi sge, %3, %4 : vector<16x256xi32>
    %cst = arith.constant 0.000000e+00 : f32
    %6 = vector.broadcast %cst : f32 to vector<16x256xf32>
    %7 = arith.select %5, %2, %6 : vector<16x256xi1>, vector<16x256xf32>
    %c15_i32 = arith.constant 15 : i32
    %8 = tpu.dynamic_rotate %1 by %c15_i32 dim 0 : vector<16x256xf32>, i32 -> vector<16x256xf32>
    %9 = tpu.iota {dimensions = array<i32: 0>} : vector<16x256xi32>
    %c15_i32_3 = arith.constant 15 : i32
    %10 = vector.broadcast %c15_i32_3 : i32 to vector<16x256xi32>
    %11 = arith.cmpi slt, %9, %10 : vector<16x256xi32>
    %cst_4 = arith.constant 0.000000e+00 : f32
    %12 = vector.broadcast %cst_4 : f32 to vector<16x256xf32>
    %13 = arith.select %11, %8, %12 : vector<16x256xi1>, vector<16x256xf32>
    %14 = tpu.concatenate %7, %1, %13 in 1 : vector<16x256xf32>, vector<16x256xf32>, vector<16x256xf32> -> vector<16x768xf32>
    %c0_5 = arith.constant 0 : index
    %c0_6 = arith.constant 0 : index
    %15 = vector.load %arg2[%c0_5, %c0_6] : memref<768x256xf32, #tpu.memory_space<vmem>>, vector<768x256xf32>
    %cst_7 = arith.constant dense<0.000000e+00> : vector<16x256xf32>
    %16 = tpu.matmul %14, %15, %cst_7 {dimension_numbers = #tpu.dot_dimension_numbers<[1], [0], [0], [1], [0, 0, 1, 1], [], []>} : vector<16x768xf32>, vector<768x256xf32>, vector<16x256xf32> -> vector<16x256xf32>
    %c0_8 = arith.constant 0 : index
    %c0_9 = arith.constant 0 : index
    %17 = vector.load %arg3[%c0_8, %c0_9] : memref<1x256xf32, #tpu.memory_space<vmem>>, vector<1x256xf32>
    %18 = vector.broadcast %17 : vector<1x256xf32> to vector<16x256xf32>
    %19 = arith.addf %16, %18 : vector<16x256xf32>
    %cst_10 = arith.constant 0.000000e+00 : f32
    %20 = vector.broadcast %cst_10 : f32 to vector<16x256xf32>
    %21 = arith.cmpf ogt, %19, %20 : vector<16x256xf32>
    %cst_11 = arith.constant 1.000000e-01 : f32
    %22 = vector.broadcast %cst_11 : f32 to vector<16x256xf32>
    %23 = arith.mulf %22, %19 : vector<16x256xf32>
    %24 = arith.select %21, %19, %23 : vector<16x256xi1>, vector<16x256xf32>
    %c1_i32_12 = arith.constant 1 : i32
    %25 = tpu.dynamic_rotate %24 by %c1_i32_12 dim 0 : vector<16x256xf32>, i32 -> vector<16x256xf32>
    %26 = tpu.iota {dimensions = array<i32: 0>} : vector<16x256xi32>
    %c1_i32_13 = arith.constant 1 : i32
    %27 = vector.broadcast %c1_i32_13 : i32 to vector<16x256xi32>
    %28 = arith.cmpi sge, %26, %27 : vector<16x256xi32>
    %cst_14 = arith.constant 0.000000e+00 : f32
    %29 = vector.broadcast %cst_14 : f32 to vector<16x256xf32>
    %30 = arith.select %28, %25, %29 : vector<16x256xi1>, vector<16x256xf32>
    %c15_i32_15 = arith.constant 15 : i32
    %31 = tpu.dynamic_rotate %24 by %c15_i32_15 dim 0 : vector<16x256xf32>, i32 -> vector<16x256xf32>
    %32 = tpu.iota {dimensions = array<i32: 0>} : vector<16x256xi32>
    %c15_i32_16 = arith.constant 15 : i32
    %33 = vector.broadcast %c15_i32_16 : i32 to vector<16x256xi32>
    %34 = arith.cmpi slt, %32, %33 : vector<16x256xi32>
    %cst_17 = arith.constant 0.000000e+00 : f32
    %35 = vector.broadcast %cst_17 : f32 to vector<16x256xf32>
    %36 = arith.select %34, %31, %35 : vector<16x256xi1>, vector<16x256xf32>
    %37 = tpu.concatenate %30, %24, %36 in 1 : vector<16x256xf32>, vector<16x256xf32>, vector<16x256xf32> -> vector<16x768xf32>
    %c0_18 = arith.constant 0 : index
    %c0_19 = arith.constant 0 : index
    %38 = vector.load %arg4[%c0_18, %c0_19] : memref<768x256xf32, #tpu.memory_space<vmem>>, vector<768x256xf32>
    %cst_20 = arith.constant dense<0.000000e+00> : vector<16x256xf32>
    %39 = tpu.matmul %37, %38, %cst_20 {dimension_numbers = #tpu.dot_dimension_numbers<[1], [0], [0], [1], [0, 0, 1, 1], [], []>} : vector<16x768xf32>, vector<768x256xf32>, vector<16x256xf32> -> vector<16x256xf32>
    %c0_21 = arith.constant 0 : index
    %c0_22 = arith.constant 0 : index
    %40 = vector.load %arg5[%c0_21, %c0_22] : memref<1x256xf32, #tpu.memory_space<vmem>>, vector<1x256xf32>
    %41 = vector.broadcast %40 : vector<1x256xf32> to vector<16x256xf32>
    %42 = arith.addf %39, %41 : vector<16x256xf32>
    %cst_23 = arith.constant dense<0.000000e+00> : vector<256xf32>
    %43 = vector.multi_reduction <add>, %42, %cst_23 [0] : vector<16x256xf32> to vector<256xf32>
    %44 = vector.shape_cast %43 : vector<256xf32> to vector<1x256xf32>
    %c0_24 = arith.constant 0 : index
    %c0_25 = arith.constant 0 : index
    %45 = vector.load %arg6[%c0_24, %c0_25] : memref<4x256xf32, #tpu.memory_space<vmem>>, vector<4x256xf32>
    %46 = vector.broadcast %44 : vector<1x256xf32> to vector<4x256xf32>
    %47 = arith.mulf %46, %45 : vector<4x256xf32>
    %cst_26 = arith.constant dense<0.000000e+00> : vector<4xf32>
    %48 = vector.multi_reduction <add>, %47, %cst_26 [1] : vector<4x256xf32> to vector<4xf32>
    %49 = vector.shape_cast %48 : vector<4xf32> to vector<4x1xf32>
    %c0_27 = arith.constant 0 : index
    %c0_28 = arith.constant 0 : index
    %50 = vector.load %arg7[%c0_27, %c0_28] : memref<4x1xf32, #tpu.memory_space<vmem>>, vector<4x1xf32>
    %51 = arith.addf %49, %50 : vector<4x1xf32>
    %cst_29 = arith.constant 0.000000e+00 : f32
    %52 = vector.broadcast %cst_29 : f32 to vector<4x1xf32>
    %53 = arith.cmpf ogt, %51, %52 : vector<4x1xf32>
    %cst_30 = arith.constant 1.000000e-01 : f32
    %54 = vector.broadcast %cst_30 : f32 to vector<4x1xf32>
    %55 = arith.mulf %54, %51 : vector<4x1xf32>
    %56 = arith.select %53, %51, %55 : vector<4x1xi1>, vector<4x1xf32>
    %c0_31 = arith.constant 0 : index
    %c0_32 = arith.constant 0 : index
    %57 = vector.load %arg8[%c0_31, %c0_32] : memref<4x256xf32, #tpu.memory_space<vmem>>, vector<4x256xf32>
    %58 = vector.broadcast %56 : vector<4x1xf32> to vector<4x256xf32>
    %59 = arith.mulf %58, %57 : vector<4x256xf32>
    %cst_33 = arith.constant dense<0.000000e+00> : vector<256xf32>
    %60 = vector.multi_reduction <add>, %59, %cst_33 [0] : vector<4x256xf32> to vector<256xf32>
    %61 = vector.shape_cast %60 : vector<256xf32> to vector<1x256xf32>
    %c0_34 = arith.constant 0 : index
    %c0_35 = arith.constant 0 : index
    %62 = vector.load %arg9[%c0_34, %c0_35] : memref<1x256xf32, #tpu.memory_space<vmem>>, vector<1x256xf32>
    %63 = arith.addf %61, %62 : vector<1x256xf32>
    %64 = arith.negf %63 : vector<1x256xf32>
    %65 = math.exp %64 : vector<1x256xf32>
    %cst_36 = arith.constant 1.000000e+00 : f32
    %66 = vector.broadcast %cst_36 : f32 to vector<1x256xf32>
    %67 = arith.addf %66, %65 : vector<1x256xf32>
    %68 = arith.divf %66, %67 : vector<1x256xf32>
    %69 = vector.broadcast %68 : vector<1x256xf32> to vector<16x256xf32>
    %70 = arith.mulf %42, %69 : vector<16x256xf32>
    %71 = arith.addf %70, %1 : vector<16x256xf32>
    %c0_37 = arith.constant 0 : index
    %c0_38 = arith.constant 0 : index
    %c0_39 = arith.constant 0 : index
    %72 = vector.load %arg10[%c0_37, %c0_38, %c0_39] : memref<1x16x256xf32, #tpu.memory_space<vmem>>, vector<1x16x256xf32>
    %73 = vector.shape_cast %72 : vector<1x16x256xf32> to vector<16x256xf32>
    %74 = vector.shape_cast %71 : vector<16x256xf32> to vector<1x16x256xf32>
    tpu.vector_store %arg10[%c0_37, %c0_38, %c0_39], %74 {strides = array<i32>} : memref<1x16x256xf32, #tpu.memory_space<vmem>>, vector<1x16x256xf32>,
    return
  }
  func.func @transform_0(%arg0: i32) -> (i32, i32, i32) {
    %c0_i32 = arith.constant 0 : i32
    %c0_i32_0 = arith.constant 0 : i32
    %c0_i32_1 = arith.constant 0 : i32
    return %arg0, %c0_i32, %c0_i32_0 : i32, i32, i32
  }
  func.func @transform_1(%arg0: i32) -> (i32, i32) {
    %c0_i32 = arith.constant 0 : i32
    %c0_i32_0 = arith.constant 0 : i32
    %c0_i32_1 = arith.constant 0 : i32
    return %c0_i32, %c0_i32_0 : i32, i32
  }
  func.func @transform_2(%arg0: i32) -> (i32, i32) {
    %c0_i32 = arith.constant 0 : i32
    %c0_i32_0 = arith.constant 0 : i32
    %c0_i32_1 = arith.constant 0 : i32
    return %c0_i32, %c0_i32_0 : i32, i32
  }
  func.func @transform_3(%arg0: i32) -> (i32, i32) {
    %c0_i32 = arith.constant 0 : i32
    %c0_i32_0 = arith.constant 0 : i32
    %c0_i32_1 = arith.constant 0 : i32
    return %c0_i32, %c0_i32_0 : i32, i32
  }
  func.func @transform_4(%arg0: i32) -> (i32, i32) {
    %c0_i32 = arith.constant 0 : i32
    %c0_i32_0 = arith.constant 0 : i32
    %c0_i32_1 = arith.constant 0 : i32
    return %c0_i32, %c0_i32_0 : i32, i32
  }
  func.func @transform_5(%arg0: i32) -> (i32, i32) {
    %c0_i32 = arith.constant 0 : i32
    %c0_i32_0 = arith.constant 0 : i32
    %c0_i32_1 = arith.constant 0 : i32
    return %c0_i32, %c0_i32_0 : i32, i32
  }
  func.func @transform_6(%arg0: i32) -> (i32, i32) {
    %c0_i32 = arith.constant 0 : i32
    %c0_i32_0 = arith.constant 0 : i32
    %c0_i32_1 = arith.constant 0 : i32
    return %c0_i32, %c0_i32_0 : i32, i32
  }
  func.func @transform_7(%arg0: i32) -> (i32, i32) {
    %c0_i32 = arith.constant 0 : i32
    %c0_i32_0 = arith.constant 0 : i32
    %c0_i32_1 = arith.constant 0 : i32
    return %c0_i32, %c0_i32_0 : i32, i32
  }
  func.func @transform_8(%arg0: i32) -> (i32, i32) {
    %c0_i32 = arith.constant 0 : i32
    %c0_i32_0 = arith.constant 0 : i32
    %c0_i32_1 = arith.constant 0 : i32
    return %c0_i32, %c0_i32_0 : i32, i32
  }
  func.func @transform_9(%arg0: i32) -> (i32, i32, i32) {
    %c0_i32 = arith.constant 0 : i32
    %c0_i32_0 = arith.constant 0 : i32
    %c0_i32_1 = arith.constant 0 : i32
    return %arg0, %c0_i32, %c0_i32_0 : i32, i32, i32
  }
}

</mosaic_0001>

<bundles_post_ra>
// kernel: rcab_pallas.1
= control target key start
LH: loop header
LB: loop body
LE: loop exit
PB: predicated region body
PF: predicated region fallthrough
CT: control target
= control target key end

     0   :  { %14 = vsyncpa [#allocation3], 0  ;;  %s1924_s0 = inlined_call_operand.vmem [shape: f32[2,16,256], index: 0, kind: input, shape index: {}]   ;;  %s1925_s1 = inlined_call_operand.hbm [shape: f32[768,256], index: 1, kind: input, shape index: {}]   ;;  %s1926_s2 = inlined_call_operand.vmem [shape: f32[1,256], index: 2, kind: input, shape index: {}]   ;;  %s1927_s3 = inlined_call_operand.hbm [shape: f32[768,256], index: 3, kind: input, shape index: {}]   ;;  %s1928_s4 = inlined_call_operand.vmem [shape: f32[1,256], index: 4, kind: input, shape index: {}]   ;;  %s1929_s5 = inlined_call_operand.vmem [shape: f32[4,256], index: 5, kind: input, shape index: {}]   ;;  %s1930_s6 = inlined_call_operand.vmem [shape: f32[4,1], index: 6, kind: input, shape index: {}]   ;;  %s1931_s7 = inlined_call_operand.vmem [shape: f32[4,256], index: 7, kind: input, shape index: {}]   ;;  %s1932_s8 = inlined_call_operand.vmem [shape: f32[1,256], index: 8, kind: input, shape index: {}]   ;;  %s1933_s9 = inlined_call_operand.vmem [shape: f32[2,16,256], index: 9, kind: output, shape index: {}]  }
   0x1   :  { %15 = vsyncpa [#allocation5], 0  ;;  %s1682_s30 = smov 0  }
   0x2 LB: > { %s1688_s10 = sadd.s32 4294967295, %s1625_s30   ;;  %p1487_p0 = scmp.ge.s32.totalorder %s1625_s30, 1  ;;  %s1625_s30 = sphi %s1682_s30, %s21_s30  }
   0x3   : > { %p246_p1 = scmp.lt.s32.totalorder %s1625_s30, 3  ;;  %s1627_s11 = smov [#allocation2]  }
   0x4   : > { %s258_s12 = sshll.u32 %s1627_s11, 4  ;;  %p1527_p3 = scmp.eq.s32.totalorder %s1688_s10, 0  ;;  %s259_s12 = int_to_ptr.vmem [resolvable:$true] %s258_s12 }
   0x5   : > { %p1692_p2 = pnand %p1487_p0, %p246_p1  ;;  %s1628_s14 = smov [#allocation4]  }
   0x6   : > { %s274_s15 = sshll.u32 %s1628_s14, 4  ;;  %s1570_s17 = scalar_lea.vmem %s259_s12, 24576  ;;  %s275_s15 = int_to_ptr.vmem [resolvable:$true] %s274_s15 }
   0x7   : > { %p1520_p4 = pneg %p1692_p2  ;;  %p1571_p7 = scmp.ne.s32.totalorder %s259_s12, %s1570_s17 }
   0x8   : > { %p1578_p10 = scmp.lt.s32.totalorder %s259_s12, %s259_s12  ;;  %p1579_p11 = scmp.lt.s32.totalorder %s1570_s17, %s1570_s17 }
   0x9   : > { %p1701_p5 = pnand %p1527_p3, %p1520_p4 }
   0xa   : > { %p1580_p12 = por %p1579_p11, %p1578_p10 }
   0xb   : > { %p1561_p6 = pneg %p1701_p5 }
   0xd   : > { %p1573_p8 = pnand %p1571_p7, %p1561_p6 }
   0xf   : > { %p1574_p9 = pneg %p1573_p8 }
  0x11   : > { %p1581_p13 = pnand %p1580_p12, %p1574_p9 }
  0x13   : > { %1584 = shalt.err (!%p1581_p13)
}
  0x14   : > { %s1629_s18 = smov 256   ;;  %s1630_s19 = smov 16  }
  0x15   : > { %1523 = dma.hbm_to_vmem [thread:$0]  (!%p1701_p5), %s1925_s1, 24576, %s259_s12, [#allocation3], %s1629_s18, %s1629_s18, %s1630_s19  }
  0x16   : > { %s1596_s22 = scalar_lea.vmem %s275_s15, 24576  ;;  %p1604_p7 = scmp.lt.s32.totalorder %s275_s15, %s275_s15 }
  0x17   : > { %p1597_p0 = scmp.ne.s32.totalorder %s275_s15, %s1596_s22  ;;  %p1605_p8 = scmp.lt.s32.totalorder %s1596_s22, %s1596_s22 }
  0x19   : > { %p1599_p1 = pnand %p1597_p0, %p1561_p6  ;;  %p1606_p10 = por %p1605_p8, %p1604_p7 }
  0x1b   : > { %p1600_p4 = pneg %p1599_p1 }
  0x1d   : > { %p1607_p9 = pnand %p1606_p10, %p1600_p4 }
  0x1f   : > { %1610 = shalt.err (!%p1607_p9)
}
  0x20   : > { %1526 = dma.hbm_to_vmem [thread:$0]  (!%p1701_p5), %s1927_s3, 24576, %s275_s15, [#allocation5], %s1629_s18, %s1629_s18, %s1630_s19  }
  0x21   : > { %313 = sbr.rel (%p1692_p2) target bundleno = 987 (0x3db), region = 56 }
  0x26   : > { %1616 = dma.done.wait (%p1527_p3), [#allocation3], 24576  }
  0x27   : > { %1618 = vsyncadd (%p1527_p3), [#allocation3], 4294942720 }
  0x28   : > { %1620 = dma.done.wait (%p1527_p3), [#allocation5], 24576  }
  0x29   : > { %1622 = vsyncadd (%p1527_p3), [#allocation5], 4294942720  ;;  %v431_v0 = vld [vmem:[#allocation2 + $0xf8] sm:$0xff]  ;;  %v430_v1 = vld [vmem:[#allocation2 + $0xf0] sm:$0xff]  ;;  %p353_p2 = scmp.lt.s32.totalorder %s1688_s10, 1  ;;  %vm1326_vm8 = vcmask 1043456  }
  0x2a   : > { %v429_v2 = vld [vmem:[#allocation2 + $0xe8] sm:$0xff]  ;;  %604 = vmatprep.subr.mxu0 %v431_v0  ;;  %v495_v3 = vld [vmem:[#allocation2 + $0x2f8] sm:$0xff]  ;;  %v428_v4 = vld [vmem:[#allocation2 + $0xe0] sm:$0xff] }
  0x2b   : > { %v494_v5 = vld [vmem:[#allocation2 + $0x2f0] sm:$0xff]  ;;  %605 = vmatpush1.msra.mxu0 %v430_v1  ;;  %681 = vmatprep.subr.mxu1 %v495_v3  ;;  %v427_v6 = vld [vmem:[#allocation2 + $0xd8] sm:$0xff]  ;;  %v493_v7 = vld [vmem:[#allocation2 + $0x2e8] sm:$0xff]  ;;  %s1937_s10 = smov (!%p353_p2, %s1688_s10), 1 }
  0x2c   : > { %606 = vmatprep.subr.mxu0 %v429_v2  ;;  %682 = vmatpush1.msra.mxu1 %v494_v5  ;;  %v426_v8 = vld [vmem:[#allocation2 + $0xd0] sm:$0xff]  ;;  %v492_v9 = vld [vmem:[#allocation2 + $0x2e0] sm:$0xff]  ;;  %v491_v10 = vld [vmem:[#allocation2 + $0x2d8] sm:$0xff]  ;;  %s1510_s25 = sshll.u32 %s1937_s10, 5 }
  0x2d   : > { %607 = vmatpush1.msra.mxu0 %v428_v4  ;;  %683 = vmatprep.subr.mxu1 %v493_v7  ;;  %v425_v11 = vld [vmem:[#allocation2 + $0xc8] sm:$0xff]  ;;  %v490_v12 = vld [vmem:[#allocation2 + $0x2d0] sm:$0xff]  ;;  %v424_v13 = vld [vmem:[#allocation2 + $0xc0] sm:$0xff]  ;;  %s1745_s28 = scalar_lea.vmem %s1924_s0, %s1510_s25  ;;  %s362_s24 = scalar_lea.vmem %s1933_s9, %s1510_s25 }
  0x2e   : > { %608 = vmatprep.subr.mxu0 %v427_v6  ;;  %684 = vmatpush1.msra.mxu1 %v492_v9  ;;  %v489_v14 = vld [vmem:[#allocation2 + $0x2c8] sm:$0xff]  ;;  %v423_v15 = vld [vmem:[#allocation2 + $0xb8] sm:$0xff]  ;;  %v488_v16 = vld [vmem:[#allocation2 + $0x2c0] sm:$0xff] }
  0x2f   : > { %609 = vmatpush1.msra.mxu0 %v426_v8  ;;  %685 = vmatprep.subr.mxu1 %v491_v10  ;;  %v422_v17 = vld [vmem:[#allocation2 + $0xb0] sm:$0xff]  ;;  %v487_v18 = vld [vmem:[#allocation2 + $0x2b8] sm:$0xff]  ;;  %v421_v19 = vld [vmem:[#allocation2 + $0xa8] sm:$0xff] }
  0x30   : > { %610 = vmatprep.subr.mxu0 %v425_v11  ;;  %686 = vmatpush1.msra.mxu1 %v490_v12  ;;  %v486_v20 = vld [vmem:[#allocation2 + $0x2b0] sm:$0xff]  ;;  %v420_v21 = vld [vmem:[#allocation2 + $0xa0] sm:$0xff]  ;;  %v485_v22 = vld [vmem:[#allocation2 + $0x2a8] sm:$0xff] }
  0x31   : > { %611 = vmatpush1.msra.mxu0 %v424_v13  ;;  %687 = vmatprep.subr.mxu1 %v489_v14  ;;  %v419_v23 = vld [vmem:[#allocation2 + $0x98] sm:$0xff]  ;;  %v484_v24 = vld [vmem:[#allocation2 + $0x2a0] sm:$0xff]  ;;  %v418_v25 = vld [vmem:[#allocation2 + $0x90] sm:$0xff] }
  0x32   : > { %612 = vmatprep.subr.mxu0 %v423_v15  ;;  %688 = vmatpush1.msra.mxu1 %v488_v16  ;;  %v483_v26 = vld [vmem:[#allocation2 + $0x298] sm:$0xff]  ;;  %v417_v27 = vld [vmem:[#allocation2 + $0x88] sm:$0xff]  ;;  %v482_v28 = vld [vmem:[#allocation2 + $0x290] sm:$0xff] }
  0x33   : > { %613 = vmatpush1.msra.mxu0 %v422_v17  ;;  %689 = vmatprep.subr.mxu1 %v487_v18  ;;  %v416_v29 = vld [vmem:[#allocation2 + $0x80] sm:$0xff]  ;;  %v481_v30 = vld [vmem:[#allocation2 + $0x288] sm:$0xff]  ;;  %v415_v31 = vld [vmem:[#allocation2 + $0x78] sm:$0xff] }
  0x34   : > { %614 = vmatprep.subr.mxu0 %v421_v19  ;;  %690 = vmatpush1.msra.mxu1 %v486_v20  ;;  %v480_v32 = vld [vmem:[#allocation2 + $0x280] sm:$0xff]  ;;  %v414_v33 = vld [vmem:[#allocation2 + $0x70] sm:$0xff]  ;;  %v479_v34 = vld [vmem:[#allocation2 + $0x278] sm:$0xff] }
  0x35   : > { %615 = vmatpush1.msra.mxu0 %v420_v21  ;;  %691 = vmatprep.subr.mxu1 %v485_v22  ;;  %v413_v35 = vld [vmem:[#allocation2 + $0x68] sm:$0xff]  ;;  %v478_v36 = vld [vmem:[#allocation2 + $0x270] sm:$0xff]  ;;  %v412_v37 = vld [vmem:[#allocation2 + $0x60] sm:$0xff] }
  0x36   : > { %616 = vmatprep.subr.mxu0 %v419_v23  ;;  %692 = vmatpush1.msra.mxu1 %v484_v24  ;;  %v477_v38 = vld [vmem:[#allocation2 + $0x268] sm:$0xff]  ;;  %v411_v39 = vld [vmem:[#allocation2 + $0x58] sm:$0xff]  ;;  %v476_v40 = vld [vmem:[#allocation2 + $0x260] sm:$0xff] }
  0x37   : > { %617 = vmatpush1.msra.mxu0 %v418_v25  ;;  %693 = vmatprep.subr.mxu1 %v483_v26  ;;  %v410_v41 = vld [vmem:[#allocation2 + $0x50] sm:$0xff]  ;;  %v475_v42 = vld [vmem:[#allocation2 + $0x258] sm:$0xff]  ;;  %v409_v43 = vld [vmem:[#allocation2 + $0x48] sm:$0xff] }
  0x38   : > { %618 = vmatprep.subr.mxu0 %v417_v27  ;;  %694 = vmatpush1.msra.mxu1 %v482_v28  ;;  %v474_v44 = vld [vmem:[#allocation2 + $0x250] sm:$0xff]  ;;  %v408_v45 = vld [vmem:[#allocation2 + $0x40] sm:$0xff]  ;;  %v473_v46 = vld [vmem:[#allocation2 + $0x248] sm:$0xff] }
  0x39   : > { %619 = vmatpush1.msra.mxu0 %v416_v29  ;;  %695 = vmatprep.subr.mxu1 %v481_v30  ;;  %v407_v47 = vld [vmem:[#allocation2 + $0x38] sm:$0xff]  ;;  %v472_v48 = vld [vmem:[#allocation2 + $0x240] sm:$0xff]  ;;  %v406_v49 = vld [vmem:[#allocation2 + $0x30] sm:$0xff] }
  0x3a   : > { %620 = vmatprep.subr.mxu0 %v415_v31  ;;  %696 = vmatpush1.msra.mxu1 %v480_v32  ;;  %v471_v50 = vld [vmem:[#allocation2 + $0x238] sm:$0xff]  ;;  %v405_v51 = vld [vmem:[#allocation2 + $0x28] sm:$0xff]  ;;  %v470_v52 = vld [vmem:[#allocation2 + $0x230] sm:$0xff] }
  0x3b   : > { %621 = vmatpush1.msra.mxu0 %v414_v33  ;;  %697 = vmatprep.subr.mxu1 %v479_v34  ;;  %v404_v53 = vld [vmem:[#allocation2 + $0x20] sm:$0xff]  ;;  %v469_v54 = vld [vmem:[#allocation2 + $0x228] sm:$0xff]  ;;  %v403_v55 = vld [vmem:[#allocation2 + $0x18] sm:$0xff] }
  0x3c   : > { %622 = vmatprep.subr.mxu0 %v413_v35  ;;  %698 = vmatpush1.msra.mxu1 %v478_v36  ;;  %v468_v56 = vld [vmem:[#allocation2 + $0x220] sm:$0xff]  ;;  %v402_v57 = vld [vmem:[#allocation2 + $0x10] sm:$0xff]  ;;  %v467_v58 = vld [vmem:[#allocation2 + $0x218] sm:$0xff] }
  0x3d   : > { %623 = vmatpush1.msra.mxu0 %v412_v37  ;;  %699 = vmatprep.subr.mxu1 %v477_v38  ;;  %v401_v59 = vld [vmem:[#allocation2 + $0x8] sm:$0xff]  ;;  %v466_v60 = vld [vmem:[#allocation2 + $0x210] sm:$0xff]  ;;  %v400_v61 = vld [vmem:[#allocation2] sm:$0xff] }
  0x3e   : > { %624 = vmatprep.subr.mxu0 %v411_v39  ;;  %700 = vmatpush1.msra.mxu1 %v476_v40  ;;  %v465_v62 = vld [vmem:[#allocation2 + $0x208] sm:$0xff]  ;;  %v463_v63 = vld [vmem:[#allocation2 + $0x1f8] sm:$0xff]  ;;  %v464_v0 = vld [vmem:[#allocation2 + $0x200] sm:$0xff]  ;;  %v371_v39 = vlaneseq }
  0x3f   : > { %625 = vmatpush1.msra.mxu0 %v410_v41  ;;  %701 = vmatprep.subr.mxu1 %v475_v42  ;;  %v462_v1 = vld [vmem:[#allocation2 + $0x1f0] sm:$0xff]  ;;  %v527_v2 = vld [vmem:[#allocation2 + $0x3f8] sm:$0xff]  ;;  %v461_v3 = vld [vmem:[#allocation2 + $0x1e8] sm:$0xff] }
  0x40   : > { %626 = vmatprep.subr.mxu0 %v409_v43  ;;  %702 = vmatpush1.msra.mxu1 %v474_v44  ;;  %v526_v4 = vld [vmem:[#allocation2 + $0x3f0] sm:$0xff]  ;;  %v460_v5 = vld [vmem:[#allocation2 + $0x1e0] sm:$0xff]  ;;  %v525_v6 = vld [vmem:[#allocation2 + $0x3e8] sm:$0xff] }
  0x41   : > { %627 = vmatpush1.msra.mxu0 %v408_v45  ;;  %703 = vmatprep.subr.mxu1 %v473_v46  ;;  %v459_v7 = vld [vmem:[#allocation2 + $0x1d8] sm:$0xff]  ;;  %v524_v8 = vld [vmem:[#allocation2 + $0x3e0] sm:$0xff]  ;;  %v458_v9 = vld [vmem:[#allocation2 + $0x1d0] sm:$0xff] }
  0x42   : > { %628 = vmatprep.subr.mxu0 %v407_v47  ;;  %704 = vmatpush1.msra.mxu1 %v472_v48  ;;  %v523_v10 = vld [vmem:[#allocation2 + $0x3d8] sm:$0xff]  ;;  %v457_v11 = vld [vmem:[#allocation2 + $0x1c8] sm:$0xff]  ;;  %v522_v12 = vld [vmem:[#allocation2 + $0x3d0] sm:$0xff] }
  0x43   : > { %629 = vmatpush1.msra.mxu0 %v406_v49  ;;  %705 = vmatprep.subr.mxu1 %v471_v50  ;;  %v456_v13 = vld [vmem:[#allocation2 + $0x1c0] sm:$0xff]  ;;  %v521_v14 = vld [vmem:[#allocation2 + $0x3c8] sm:$0xff]  ;;  %v455_v15 = vld [vmem:[#allocation2 + $0x1b8] sm:$0xff]  ;;  %v1753_v50 = vshrl.u32 %v371_v39, 7 }
  0x44   : > { %630 = vmatprep.subr.mxu0 %v405_v51  ;;  %706 = vmatpush1.msra.mxu1 %v470_v52  ;;  %v520_v16 = vld [vmem:[#allocation2 + $0x3c0] sm:$0xff]  ;;  %v454_v17 = vld [vmem:[#allocation2 + $0x1b0] sm:$0xff]  ;;  %v519_v18 = vld [vmem:[#allocation2 + $0x3b8] sm:$0xff] }
  0x45   : > { %631 = vmatpush1.msra.mxu0 %v404_v53  ;;  %707 = vmatprep.subr.mxu1 %v469_v54  ;;  %v453_v19 = vld [vmem:[#allocation2 + $0x1a8] sm:$0xff]  ;;  %v518_v20 = vld [vmem:[#allocation2 + $0x3b0] sm:$0xff]  ;;  %v452_v21 = vld [vmem:[#allocation2 + $0x1a0] sm:$0xff]  ;;  %vm373_vm0 = vcmp.lt.s32.totalorder %v1753_v50, 1  ;;  %vm379_vm1 = vcmp.ge.s32.totalorder %v1753_v50, 1  ;;  %vm389_vm2 = vcmp.lt.s32.totalorder %v1753_v50, 7 }
  0x46   : > { %632 = vmatprep.subr.mxu0 %v403_v55  ;;  %708 = vmatpush1.msra.mxu1 %v468_v56  ;;  %v517_v22 = vld [vmem:[#allocation2 + $0x3a8] sm:$0xff]  ;;  %v451_v23 = vld [vmem:[#allocation2 + $0x198] sm:$0xff]  ;;  %v516_v24 = vld [vmem:[#allocation2 + $0x3a0] sm:$0xff] }
  0x47   : > { %633 = vmatpush1.msra.mxu0 %v402_v57  ;;  %709 = vmatprep.subr.mxu1 %v467_v58  ;;  %v450_v25 = vld [vmem:[#allocation2 + $0x190] sm:$0xff]  ;;  %v515_v26 = vld [vmem:[#allocation2 + $0x398] sm:$0xff]  ;;  %v449_v27 = vld [vmem:[#allocation2 + $0x188] sm:$0xff] }
  0x48   : > { %634 = vmatprep.subr.mxu0 %v401_v59  ;;  %710 = vmatpush1.msra.mxu1 %v466_v60  ;;  %v514_v28 = vld [vmem:[#allocation2 + $0x390] sm:$0xff]  ;;  %v448_v29 = vld [vmem:[#allocation2 + $0x180] sm:$0xff]  ;;  %v513_v30 = vld [vmem:[#allocation2 + $0x388] sm:$0xff] }
  0x49   : > { %635 = vmatpush1.msra.mxu0 %v400_v61  ;;  %711 = vmatprep.subr.mxu1 %v465_v62  ;;  %v447_v31 = vld [vmem:[#allocation2 + $0x178] sm:$0xff]  ;;  %v512_v32 = vld [vmem:[#allocation2 + $0x380] sm:$0xff]  ;;  %v446_v33 = vld [vmem:[#allocation2 + $0x170] sm:$0xff] }
  0x4a   : > { %636 = vmatprep.subr.mxu0 %v463_v63  ;;  %712 = vmatpush1.msra.mxu1 %v464_v0  ;;  %v511_v34 = vld [vmem:[#allocation2 + $0x378] sm:$0xff]  ;;  %v445_v35 = vld [vmem:[#allocation2 + $0x168] sm:$0xff]  ;;  %v510_v36 = vld [vmem:[#allocation2 + $0x370] sm:$0xff] }
  0x4b   : > { %637 = vmatpush2.msra.mxu0 %v462_v1  ;;  %713 = vmatprep.subr.mxu1 %v527_v2  ;;  %v444_v37 = vld [vmem:[#allocation2 + $0x160] sm:$0xff]  ;;  %v509_v38 = vld [vmem:[#allocation2 + $0x368] sm:$0xff]  ;;  %v443_v40 = vld [vmem:[#allocation2 + $0x158] sm:$0xff] }
  0x4c   : > { %638 = vmatprep.subr.mxu0 %v461_v3  ;;  %714 = vmatpush2.msra.mxu1 %v526_v4  ;;  %v508_v41 = vld [vmem:[#allocation2 + $0x360] sm:$0xff]  ;;  %v442_v42 = vld [vmem:[#allocation2 + $0x150] sm:$0xff]  ;;  %v507_v43 = vld [vmem:[#allocation2 + $0x358] sm:$0xff] }
  0x4d   : > { %639 = vmatpush2.msra.mxu0 %v460_v5  ;;  %715 = vmatprep.subr.mxu1 %v525_v6  ;;  %v441_v44 = vld [vmem:[#allocation2 + $0x148] sm:$0xff]  ;;  %v440_v45 = vld [vmem:[#allocation2 + $0x140] sm:$0xff]  ;;  %v506_v46 = vld [vmem:[#allocation2 + $0x350] sm:$0xff] }
  0x4e   : > { %640 = vmatprep.subr.mxu0 %v459_v7  ;;  %716 = vmatpush2.msra.mxu1 %v524_v8  ;;  %v505_v47 = vld [vmem:[#allocation2 + $0x348] sm:$0xff]  ;;  %v1751_v49 = vld [vmem:[%s1745_s28 + $0x18] sm:$0xff]  ;;  %v438_v52 = vld [vmem:[#allocation2 + $0x130] sm:$0xff] }
  0x4f   : > { %641 = vmatpush2.msra.mxu0 %v458_v9  ;;  %717 = vmatprep.subr.mxu1 %v523_v10  ;;  %v1748_v48 = vld [vmem:[%s1745_s28 + $0x8] sm:$0xff]  ;;  %v439_v51 = vld [vmem:[#allocation2 + $0x138] sm:$0xff]  ;;  %v504_v53 = vld [vmem:[#allocation2 + $0x340] sm:$0xff]  ;;  %v370_v60 = vrot.slane %v1751_v49, 7 }
  0x50   : > { %642 = vmatprep.subr.mxu0 %v457_v11  ;;  %718 = vmatpush2.msra.mxu1 %v522_v12  ;;  %v503_v54 = vld [vmem:[#allocation2 + $0x338] sm:$0xff]  ;;  %v1756_v55 = vld [vmem:[%s1745_s28] sm:$0xff]  ;;  %v1759_v56 = vld [vmem:[%s1745_s28 + $0x10] sm:$0xff]  ;;  %v368_v59 = vrot.slane %v1748_v48, 7 }
  0x51   : > { %643 = vmatpush2.msra.mxu0 %v456_v13  ;;  %719 = vmatprep.subr.mxu1 %v521_v14  ;;  %v437_v57 = vld [vmem:[#allocation2 + $0x128] sm:$0xff]  ;;  %v502_v58 = vld [vmem:[#allocation2 + $0x330] sm:$0xff]  ;;  %v436_v61 = vld [vmem:[#allocation2 + $0x120] sm:$0xff]  ;;  %v367_v1 = vrot.slane %v1756_v55, 7  ;;  %v369_v2 = vrot.slane %v1759_v56, 7 }
  0x52   : > { %644 = vmatprep.subr.mxu0 %v455_v15  ;;  %720 = vmatpush2.msra.mxu1 %v520_v16  ;;  %v501_v62 = vld [vmem:[#allocation2 + $0x328] sm:$0xff]  ;;  %v435_v63 = vld [vmem:[#allocation2 + $0x118] sm:$0xff]  ;;  %v500_v0 = vld [vmem:[#allocation2 + $0x320] sm:$0xff]  ;;  %v377_v6 = vsel %vm373_vm0, %v370_v60, %v368_v59  ;;  %v375_v16 = vsel %vm373_vm0, %v368_v59, %v370_v60 }
  0x53   : > { %645 = vmatpush2.msra.mxu0 %v454_v17  ;;  %721 = vmatprep.subr.mxu1 %v519_v18  ;;  %v434_v3 = vld [vmem:[#allocation2 + $0x110] sm:$0xff]  ;;  %v499_v4 = vld [vmem:[#allocation2 + $0x318] sm:$0xff]  ;;  %v433_v5 = vld [vmem:[#allocation2 + $0x108] sm:$0xff]  ;;  %v376_v9 = vsel %vm373_vm0, %v369_v2, %v367_v1  ;;  %v386_v17 = vrot.slane %v1748_v48, 1  ;;  %v388_v18 = vrot.slane %v1751_v49, 1 }
  0x54   : > { %646 = vmatprep.subr.mxu0 %v453_v19  ;;  %722 = vmatpush2.msra.mxu1 %v518_v20  ;;  %v432_v7 = vld [vmem:[#allocation2 + $0x100] sm:$0xff]  ;;  %v498_v8 = vld [vmem:[#allocation2 + $0x310] sm:$0xff]  ;;  %v497_v10 = vld [vmem:[#allocation2 + $0x308] sm:$0xff]  ;;  %v374_v20 = vsel %vm373_vm0, %v367_v1, %v369_v2 }
  0x55   : > { %647 = vmatpush2.msra.mxu0 %v452_v21  ;;  %723 = vmatprep.subr.mxu1 %v517_v22  ;;  %v559_v11 = vld [vmem:[#allocation2 + $0x4f8] sm:$0xff]  ;;  %v496_v12 = vld [vmem:[#allocation2 + $0x300] sm:$0xff]  ;;  %v558_v13 = vld [vmem:[#allocation2 + $0x4f0] sm:$0xff] }
  0x56   : > { %648 = vmatprep.subr.mxu0 %v451_v23  ;;  %724 = vmatpush2.msra.mxu1 %v516_v24  ;;  %v557_v14 = vld [vmem:[#allocation2 + $0x4e8] sm:$0xff]  ;;  %v556_v15 = vld [vmem:[#allocation2 + $0x4e0] sm:$0xff]  ;;  %v555_v19 = vld [vmem:[#allocation2 + $0x4d8] sm:$0xff]  ;;  %v391_v24 = vsel %vm389_vm2, %v386_v17, %v388_v18 }
  0x57   : > { %649 = vmatpush2.msra.mxu0 %v450_v25  ;;  %725 = vmatprep.subr.mxu1 %v515_v26  ;;  %v554_v21 = vld [vmem:[#allocation2 + $0x4d0] sm:$0xff]  ;;  %v553_v22 = vld [vmem:[#allocation2 + $0x4c8] sm:$0xff]  ;;  %v552_v23 = vld [vmem:[#allocation2 + $0x4c0] sm:$0xff] }
  0x58   : > { %650 = vmatprep.subr.mxu0 %v449_v27  ;;  %726 = vmatpush2.msra.mxu1 %v514_v28  ;;  %v551_v25 = vld [vmem:[#allocation2 + $0x4b8] sm:$0xff]  ;;  %v550_v26 = vld [vmem:[#allocation2 + $0x4b0] sm:$0xff]  ;;  %v549_v27 = vld [vmem:[#allocation2 + $0x4a8] sm:$0xff] }
  0x59   : > { %651 = vmatpush2.msra.mxu0 %v448_v29  ;;  %727 = vmatprep.subr.mxu1 %v513_v30  ;;  %v548_v28 = vld [vmem:[#allocation2 + $0x4a0] sm:$0xff]  ;;  %v547_v29 = vld [vmem:[#allocation2 + $0x498] sm:$0xff]  ;;  %v546_v30 = vld [vmem:[#allocation2 + $0x490] sm:$0xff] }
  0x5a   : > { %652 = vmatprep.subr.mxu0 %v447_v31  ;;  %728 = vmatpush2.msra.mxu1 %v512_v32  ;;  %v545_v31 = vld [vmem:[#allocation2 + $0x488] sm:$0xff]  ;;  %v544_v32 = vld [vmem:[#allocation2 + $0x480] sm:$0xff]  ;;  %v586_v59 = vld [vmem:[#allocation2 + $0x5d0] sm:$0xff] }
  0x5b   : > { %653 = vmatpush2.msra.mxu0 %v446_v33  ;;  %729 = vmatprep.subr.mxu1 %v511_v34  ;;  %v543_v33 = vld [vmem:[#allocation2 + $0x478] sm:$0xff]  ;;  %v542_v34 = vld [vmem:[#allocation2 + $0x470] sm:$0xff]  ;;  %v537_v39 = vld [vmem:[#allocation2 + $0x448] sm:$0xff] }
  0x5c   : > { %654 = vmatprep.subr.mxu0 %v445_v35  ;;  %730 = vmatpush2.msra.mxu1 %v510_v36  ;;  %v541_v35 = vld [vmem:[#allocation2 + $0x468] sm:$0xff]  ;;  %v540_v36 = vld [vmem:[#allocation2 + $0x460] sm:$0xff]  ;;  %v579_v2 = vld [vmem:[#allocation2 + $0x598] sm:$0xff] }
  0x5d   : > { %655 = vmatpush2.msra.mxu0 %v444_v37  ;;  %731 = vmatprep.subr.mxu1 %v509_v38  ;;  %v539_v37 = vld [vmem:[#allocation2 + $0x458] sm:$0xff]  ;;  %v538_v38 = vld [vmem:[#allocation2 + $0x450] sm:$0xff]  ;;  %v585_v60 = vld [vmem:[#allocation2 + $0x5c8] sm:$0xff] }
  0x5e   : > { %656 = vmatprep.subr.mxu0 %v443_v40  ;;  %732 = vmatpush2.msra.mxu1 %v508_v41  ;;  %v536_v40 = vld [vmem:[#allocation2 + $0x440] sm:$0xff]  ;;  %v535_v41 = vld [vmem:[#allocation2 + $0x438] sm:$0xff] }
  0x5f   : > { %657 = vmatpush2.msra.mxu0 %v442_v42  ;;  %733 = vmatprep.subr.mxu1 %v507_v43  ;;  %v534_v42 = vld [vmem:[#allocation2 + $0x430] sm:$0xff]  ;;  %v533_v43 = vld [vmem:[#allocation2 + $0x428] sm:$0xff]  ;;  %v580_v1 = vld [vmem:[#allocation2 + $0x5a0] sm:$0xff] }
  0x60   : > { %658 = vmatprep.subr.mxu0 %v441_v44  ;;  %734 = vmatpush2.msra.mxu1 %v506_v46  ;;  %v532_v44 = vld [vmem:[#allocation2 + $0x420] sm:$0xff]  ;;  %v530_v46 = vld [vmem:[#allocation2 + $0x410] sm:$0xff] }
  0x61   : > { %659 = vmatpush2.msra.mxu0 %v440_v45  ;;  %735 = vmatprep.subr.mxu1 %v505_v47  ;;  %v531_v45 = vld [vmem:[#allocation2 + $0x418] sm:$0xff]  ;;  %v529_v47 = vld [vmem:[#allocation2 + $0x408] sm:$0xff] }
  0x62   : > { %660 = vmatprep.subr.mxu0 %v439_v51  ;;  %736 = vmatpush2.msra.mxu1 %v504_v53  ;;  %v528_v51 = vld [vmem:[#allocation2 + $0x400] sm:$0xff]  ;;  %v590_v53 = vld [vmem:[#allocation2 + $0x5f0] sm:$0xff] }
  0x63   : > { %661 = vmatpush2.msra.mxu0 %v438_v52  ;;  %737 = vmatprep.subr.mxu1 %v503_v54  ;;  %v591_v52 = vld [vmem:[#allocation2 + $0x5f8] sm:$0xff]  ;;  %v589_v54 = vld [vmem:[#allocation2 + $0x5e8] sm:$0xff] }
  0x64   : > { %662 = vmatprep.subr.mxu0 %v437_v57  ;;  %738 = vmatpush2.msra.mxu1 %v502_v58  ;;  %v588_v57 = vld [vmem:[#allocation2 + $0x5e0] sm:$0xff]  ;;  %v587_v58 = vld [vmem:[#allocation2 + $0x5d8] sm:$0xff] }
  0x65   : > { %663 = vmatpush2.msra.mxu0 %v436_v61  ;;  %739 = vmatprep.subr.mxu1 %v501_v62  ;;  %v584_v61 = vld [vmem:[#allocation2 + $0x5c0] sm:$0xff]  ;;  %v583_v62 = vld [vmem:[#allocation2 + $0x5b8] sm:$0xff] }
  0x66   : > { %664 = vmatprep.subr.mxu0 %v435_v63  ;;  %740 = vmatpush2.msra.mxu1 %v500_v0  ;;  %v582_v63 = vld [vmem:[#allocation2 + $0x5b0] sm:$0xff]  ;;  %v581_v0 = vld [vmem:[#allocation2 + $0x5a8] sm:$0xff] }
  0x67   : > { %665 = vmatpush2.msra.mxu0 %v434_v3  ;;  %741 = vmatprep.subr.mxu1 %v499_v4  ;;  %v578_v3 = vld [vmem:[#allocation2 + $0x590] sm:$0xff]  ;;  %v577_v4 = vld [vmem:[#allocation2 + $0x588] sm:$0xff] }
  0x68   : > { %666 = vmatprep.subr.mxu0 %v433_v5  ;;  %1498 = vmatprep.mubr.msk.f32.mxu0 %vm379_vm1, %v377_v6  ;;  %v576_v5 = vld [vmem:[#allocation2 + $0x580] sm:$0xff]  ;;  %v575_v6 = vld [vmem:[#allocation2 + $0x578] sm:$0xff] }
  0x69   : > { %667 = vmatpush2.msra.mxu0 %v432_v7  ;;  %742 = vmatpush2.msra.mxu1 %v498_v8  ;;  %v574_v7 = vld [vmem:[#allocation2 + $0x570] sm:$0xff]  ;;  %v573_v8 = vld [vmem:[#allocation2 + $0x568] sm:$0xff] }
  0x6a   : > { %1499 = vmatmul.mubr.msk.f32.vlgmr.msra.gmra.mxu0 %vm379_vm1, %v376_v9  ;;  %743 = vmatprep.subr.mxu1 %v497_v10  ;;  %v572_v9 = vld [vmem:[#allocation2 + $0x560] sm:$0xff]  ;;  %v571_v10 = vld [vmem:[#allocation2 + $0x558] sm:$0xff] }
  0x6b   : > { %758 = vmatprep.subr.mxu0 %v559_v11  ;;  %744 = vmatpush2.msra.mxu1 %v496_v12  ;;  %v570_v11 = vld [vmem:[#allocation2 + $0x550] sm:$0xff]  ;;  %v569_v12 = vld [vmem:[#allocation2 + $0x548] sm:$0xff] }
  0x6c   : > { %745 = vmatprep.mubr.f32.mxu1 %v1748_v48  ;;  %759 = vmatpush1.msra.mxu0 %v558_v13  ;;  %v568_v13 = vld [vmem:[#allocation2 + $0x540] sm:$0xff]  ;;  %v965_v48 = vld [vmem:[#allocation4 + $0x2f0] sm:$0xff] }
  0x6d   : > { %746 = vmatmul.mubr.f32.vlgmr.msra.gmra.mxu1 %v1756_v55  ;;  %760 = vmatprep.subr.mxu0 %v557_v14  ;;  %v567_v14 = vld [vmem:[#allocation2 + $0x538] sm:$0xff] }
  0x6e   : > { %761 = vmatpush1.msra.mxu0 %v556_v15  ;;  %674 = vmatprep.mubr.f32.mxu0 %v375_v16  ;;  %v566_v15 = vld [vmem:[#allocation2 + $0x530] sm:$0xff]  ;;  %v565_v16 = vld [vmem:[#allocation2 + $0x528] sm:$0xff] }
  0x6f   : > { %762 = vmatprep.subr.mxu0 %v555_v19  ;;  %675 = vmatmul.mubr.f32.gmra.mxu0 %v374_v20  ;;  %v564_v19 = vld [vmem:[#allocation2 + $0x520] sm:$0xff]  ;;  %v563_v20 = vld [vmem:[#allocation2 + $0x518] sm:$0xff] }
  0x70   : > { %763 = vmatpush1.msra.mxu0 %v554_v21  ;;  %751 = vmatprep.mubr.f32.mxu1 %v1751_v49  ;;  %v385_v21 = vrot.slane %v1756_v55, 1  ;;  %v393_v55 = vsel %vm389_vm2, %v388_v18, %v386_v17  ;;  %v963_v49 = vld [vmem:[#allocation4 + $0x2e0] sm:$0xff]  ;;  %v962_v17 = vld [vmem:[#allocation4 + $0x2d8] sm:$0xff] }
  0x71   : > { %764 = vmatprep.subr.mxu0 %v553_v22  ;;  %752 = vmatmul.mubr.f32.gmra.mxu1 %v1759_v56  ;;  %v387_v22 = vrot.slane %v1759_v56, 1  ;;  %v902_v18 = vld [vmem:[#allocation4 + $0xf8] sm:$0xff] }
  0x72   : > { %765 = vmatpush1.msra.mxu0 %v552_v23  ;;  %822 = vmatprep.mubr.f32.mxu0 %v391_v24  ;;  %v562_v23 = vld [vmem:[#allocation2 + $0x510] sm:$0xff]  ;;  %v1795_v24 = vadd.s32 8, %v1753_v50 }
  0x73   : > { %766 = vmatprep.subr.mxu0 %v551_v25  ;;  %v561_v25 = vld [vmem:[#allocation2 + $0x508] sm:$0xff]  ;;  %v392_v56 = vsel %vm389_vm2, %v387_v22, %v385_v21  ;;  %1075 = vmatprep.subr.mxu1 %v902_v18  ;;  %v934_v18 = vld [vmem:[#allocation4 + $0x1f8] sm:$0xff] }
  0x74   : > { %767 = vmatpush1.msra.mxu0 %v550_v26  ;;  %v560_v26 = vld [vmem:[#allocation2 + $0x500] sm:$0xff]  ;;  %vm395_vm3 = vcmp.lt.s32.totalorder %v1795_v24, 15 }
  0x75   : > { %768 = vmatprep.subr.mxu0 %v549_v27  ;;  %v390_v27 = vsel %vm389_vm2, %v385_v21, %v387_v22  ;;  %v938_v21 = vld [vmem:[#allocation4 + $0x218] sm:$0xff]  ;;  %v876_v22 = vld [vmem:[#allocation4 + $0x28] sm:$0xff] }
  0x76   : > { %769 = vmatpush1.msra.mxu0 %v548_v28  ;;  %v966_v28 = vld [vmem:[#allocation4 + $0x2f8] sm:$0xff] }
  0x77   : > { %770 = vmatprep.subr.mxu0 %v547_v29  ;;  %v964_v29 = vld [vmem:[#allocation4 + $0x2e8] sm:$0xff] }
  0x78   : > { %771 = vmatpush1.msra.mxu0 %v546_v30  ;;  %v901_v30 = vld [vmem:[#allocation4 + $0xf0] sm:$0xff] }
  0x79   : > { %772 = vmatprep.subr.mxu0 %v545_v31  ;;  %v961_v31 = vld [vmem:[#allocation4 + $0x2d0] sm:$0xff]  ;;  %1076 = vmatpush1.msra.mxu1 %v901_v30  ;;  %v995_v30 = vld [vmem:[#allocation4 + $0x3e0] sm:$0xff] }
  0x7a   : > { %773 = vmatpush1.msra.mxu0 %v544_v32  ;;  %v900_v32 = vld [vmem:[#allocation4 + $0xe8] sm:$0xff] }
  0x7b   : > { %774 = vmatprep.subr.mxu0 %v543_v33  ;;  %v960_v33 = vld [vmem:[#allocation4 + $0x2c8] sm:$0xff]  ;;  %1077 = vmatprep.subr.mxu1 %v900_v32  ;;  %v994_v32 = vld [vmem:[#allocation4 + $0x3d8] sm:$0xff] }
  0x7c   : > { %775 = vmatpush1.msra.mxu0 %v542_v34  ;;  %v899_v34 = vld [vmem:[#allocation4 + $0xe0] sm:$0xff] }
  0x7d   : > { %776 = vmatprep.subr.mxu0 %v541_v35  ;;  %v898_v35 = vld [vmem:[#allocation4 + $0xd8] sm:$0xff]  ;;  %1078 = vmatpush1.msra.mxu1 %v899_v34  ;;  %v993_v34 = vld [vmem:[#allocation4 + $0x3d0] sm:$0xff] }
  0x7e   : > { %777 = vmatpush1.msra.mxu0 %v540_v36  ;;  %v959_v36 = vld [vmem:[#allocation4 + $0x2c0] sm:$0xff]  ;;  %1079 = vmatprep.subr.mxu1 %v898_v35 }
  0x7f   : > { %778 = vmatprep.subr.mxu0 %v539_v37  ;;  %v897_v37 = vld [vmem:[#allocation4 + $0xd0] sm:$0xff]  ;;  %v931_v35 = vld [vmem:[#allocation4 + $0x1e0] sm:$0xff] }
  0x80   : > { %779 = vmatpush1.msra.mxu0 %v538_v38  ;;  %v958_v38 = vld [vmem:[#allocation4 + $0x2b8] sm:$0xff]  ;;  %1080 = vmatpush1.msra.mxu1 %v897_v37 }
  0x81   : > { %780 = vmatprep.subr.mxu0 %v537_v39  ;;  %v896_v39 = vld [vmem:[#allocation4 + $0xc8] sm:$0xff]  ;;  %v930_v37 = vld [vmem:[#allocation4 + $0x1d8] sm:$0xff] }
  0x82   : > { %781 = vmatpush1.msra.mxu0 %v536_v40  ;;  %v957_v40 = vld [vmem:[#allocation4 + $0x2b0] sm:$0xff]  ;;  %1081 = vmatprep.subr.mxu1 %v896_v39 }
  0x83   : > { %782 = vmatprep.subr.mxu0 %v535_v41  ;;  %v895_v41 = vld [vmem:[#allocation4 + $0xc0] sm:$0xff]  ;;  %v929_v39 = vld [vmem:[#allocation4 + $0x1d0] sm:$0xff] }
  0x84   : > { %783 = vmatpush1.msra.mxu0 %v534_v42  ;;  %v956_v42 = vld [vmem:[#allocation4 + $0x2a8] sm:$0xff]  ;;  %1082 = vmatpush1.msra.mxu1 %v895_v41 }
  0x85   : > { %784 = vmatprep.subr.mxu0 %v533_v43  ;;  %v894_v43 = vld [vmem:[#allocation4 + $0xb8] sm:$0xff]  ;;  %v928_v41 = vld [vmem:[#allocation4 + $0x1c8] sm:$0xff] }
  0x86   : > { %785 = vmatpush1.msra.mxu0 %v532_v44  ;;  %v955_v44 = vld [vmem:[#allocation4 + $0x2a0] sm:$0xff]  ;;  %1083 = vmatprep.subr.mxu1 %v894_v43 }
  0x87   : > { %786 = vmatprep.subr.mxu0 %v531_v45  ;;  %v893_v45 = vld [vmem:[#allocation4 + $0xb0] sm:$0xff]  ;;  %v927_v43 = vld [vmem:[#allocation4 + $0x1c0] sm:$0xff] }
  0x88   : > { %787 = vmatpush1.msra.mxu0 %v530_v46  ;;  %v954_v46 = vld [vmem:[#allocation4 + $0x298] sm:$0xff]  ;;  %1084 = vmatpush1.msra.mxu1 %v893_v45 }
  0x89   : > { %788 = vmatprep.subr.mxu0 %v529_v47  ;;  %v892_v47 = vld [vmem:[#allocation4 + $0xa8] sm:$0xff]  ;;  %v926_v45 = vld [vmem:[#allocation4 + $0x1b8] sm:$0xff] }
  0x8a   : > { %789 = vmatpush1.msra.mxu0 %v528_v51  ;;  %v953_v51 = vld [vmem:[#allocation4 + $0x290] sm:$0xff]  ;;  %1085 = vmatprep.subr.mxu1 %v892_v47 }
  0x8b   : > { %790 = vmatprep.subr.mxu0 %v591_v52  ;;  %v891_v52 = vld [vmem:[#allocation4 + $0xa0] sm:$0xff]  ;;  %v925_v47 = vld [vmem:[#allocation4 + $0x1b0] sm:$0xff] }
  0x8c   : > { %791 = vmatpush2.msra.mxu0 %v590_v53  ;;  %v952_v53 = vld [vmem:[#allocation4 + $0x288] sm:$0xff]  ;;  %1086 = vmatpush1.msra.mxu1 %v891_v52 }
  0x8d   : > { %792 = vmatprep.subr.mxu0 %v589_v54  ;;  %v890_v54 = vld [vmem:[#allocation4 + $0x98] sm:$0xff]  ;;  %v924_v52 = vld [vmem:[#allocation4 + $0x1a8] sm:$0xff] }
  0x8e   : > { %793 = vmatpush2.msra.mxu0 %v588_v57  ;;  %v951_v57 = vld [vmem:[#allocation4 + $0x280] sm:$0xff]  ;;  %1087 = vmatprep.subr.mxu1 %v890_v54 }
  0x8f   : > { %794 = vmatprep.subr.mxu0 %v587_v58  ;;  %v889_v58 = vld [vmem:[#allocation4 + $0x90] sm:$0xff]  ;;  %v923_v54 = vld [vmem:[#allocation4 + $0x1a0] sm:$0xff] }
  0x90   : > { %795 = vmatpush2.msra.mxu0 %v586_v59  ;;  %v950_v59 = vld [vmem:[#allocation4 + $0x278] sm:$0xff]  ;;  %1088 = vmatpush1.msra.mxu1 %v889_v58 }
  0x91   : > { %796 = vmatprep.subr.mxu0 %v585_v60  ;;  %v888_v60 = vld [vmem:[#allocation4 + $0x88] sm:$0xff]  ;;  %v922_v58 = vld [vmem:[#allocation4 + $0x198] sm:$0xff] }
  0x92   : > { %797 = vmatpush2.msra.mxu0 %v584_v61  ;;  %v949_v61 = vld [vmem:[#allocation4 + $0x270] sm:$0xff]  ;;  %1089 = vmatprep.subr.mxu1 %v888_v60 }
  0x93   : > { %798 = vmatprep.subr.mxu0 %v583_v62  ;;  %v887_v62 = vld [vmem:[#allocation4 + $0x80] sm:$0xff]  ;;  %v921_v60 = vld [vmem:[#allocation4 + $0x190] sm:$0xff] }
  0x94   : > { %799 = vmatpush2.msra.mxu0 %v582_v63  ;;  %v948_v63 = vld [vmem:[#allocation4 + $0x268] sm:$0xff]  ;;  %1090 = vmatpush1.msra.mxu1 %v887_v62 }
  0x95   : > { %800 = vmatprep.subr.mxu0 %v581_v0  ;;  %v886_v0 = vld [vmem:[#allocation4 + $0x78] sm:$0xff]  ;;  %v920_v62 = vld [vmem:[#allocation4 + $0x188] sm:$0xff] }
  0x96   : > { %801 = vmatpush2.msra.mxu0 %v580_v1  ;;  %v947_v1 = vld [vmem:[#allocation4 + $0x260] sm:$0xff]  ;;  %1091 = vmatprep.subr.mxu1 %v886_v0 }
  0x97   : > { %802 = vmatprep.subr.mxu0 %v579_v2  ;;  %v885_v2 = vld [vmem:[#allocation4 + $0x70] sm:$0xff]  ;;  %v919_v0 = vld [vmem:[#allocation4 + $0x180] sm:$0xff] }
  0x98   : > { %803 = vmatpush2.msra.mxu0 %v578_v3  ;;  %v946_v3 = vld [vmem:[#allocation4 + $0x258] sm:$0xff]  ;;  %1092 = vmatpush1.msra.mxu1 %v885_v2 }
  0x99   : > { %804 = vmatprep.subr.mxu0 %v577_v4  ;;  %v884_v4 = vld [vmem:[#allocation4 + $0x68] sm:$0xff]  ;;  %v918_v2 = vld [vmem:[#allocation4 + $0x178] sm:$0xff] }
  0x9a   : > { %805 = vmatpush2.msra.mxu0 %v576_v5  ;;  %v945_v5 = vld [vmem:[#allocation4 + $0x250] sm:$0xff]  ;;  %1093 = vmatprep.subr.mxu1 %v884_v4  ;;  %v978_v4 = vld [vmem:[#allocation4 + $0x358] sm:$0xff] }
  0x9b   : > { %806 = vmatprep.subr.mxu0 %v575_v6  ;;  %v883_v6 = vld [vmem:[#allocation4 + $0x60] sm:$0xff] }
  0x9c   : > { %807 = vmatpush2.msra.mxu0 %v574_v7  ;;  %v944_v7 = vld [vmem:[#allocation4 + $0x248] sm:$0xff]  ;;  %1094 = vmatpush1.msra.mxu1 %v883_v6 }
  0x9d   : > { %808 = vmatprep.subr.mxu0 %v573_v8  ;;  %v882_v8 = vld [vmem:[#allocation4 + $0x58] sm:$0xff]  ;;  %v976_v6 = vld [vmem:[#allocation4 + $0x348] sm:$0xff] }
  0x9e   : > { %809 = vmatpush2.msra.mxu0 %v572_v9  ;;  %v943_v9 = vld [vmem:[#allocation4 + $0x240] sm:$0xff]  ;;  %1095 = vmatprep.subr.mxu1 %v882_v8 }
  0x9f   : > { %810 = vmatprep.subr.mxu0 %v571_v10  ;;  %v881_v10 = vld [vmem:[#allocation4 + $0x50] sm:$0xff]  ;;  %v975_v8 = vld [vmem:[#allocation4 + $0x340] sm:$0xff] }
  0xa0   : > { %811 = vmatpush2.msra.mxu0 %v570_v11  ;;  %v942_v11 = vld [vmem:[#allocation4 + $0x238] sm:$0xff]  ;;  %1096 = vmatpush1.msra.mxu1 %v881_v10 }
  0xa1   : > { %812 = vmatprep.subr.mxu0 %v569_v12  ;;  %v880_v12 = vld [vmem:[#allocation4 + $0x48] sm:$0xff]  ;;  %v974_v10 = vld [vmem:[#allocation4 + $0x338] sm:$0xff] }
  0xa2   : > { %813 = vmatpush2.msra.mxu0 %v568_v13  ;;  %v941_v13 = vld [vmem:[#allocation4 + $0x230] sm:$0xff]  ;;  %1097 = vmatprep.subr.mxu1 %v880_v12 }
  0xa3   : > { %814 = vmatprep.subr.mxu0 %v567_v14  ;;  %v879_v14 = vld [vmem:[#allocation4 + $0x40] sm:$0xff]  ;;  %v973_v12 = vld [vmem:[#allocation4 + $0x330] sm:$0xff] }
  0xa4   : > { %815 = vmatpush2.msra.mxu0 %v566_v15  ;;  %v940_v15 = vld [vmem:[#allocation4 + $0x228] sm:$0xff]  ;;  %1098 = vmatpush1.msra.mxu1 %v879_v14 }
  0xa5   : > { %816 = vmatprep.subr.mxu0 %v565_v16  ;;  %v878_v16 = vld [vmem:[#allocation4 + $0x38] sm:$0xff]  ;;  %v972_v14 = vld [vmem:[#allocation4 + $0x328] sm:$0xff] }
  0xa6   : > { %817 = vmatpush2.msra.mxu0 %v564_v19  ;;  %v939_v19 = vld [vmem:[#allocation4 + $0x220] sm:$0xff]  ;;  %1099 = vmatprep.subr.mxu1 %v878_v16 }
  0xa7   : > { %818 = vmatprep.subr.mxu0 %v563_v20  ;;  %v877_v20 = vld [vmem:[#allocation4 + $0x30] sm:$0xff]  ;;  %v971_v16 = vld [vmem:[#allocation4 + $0x320] sm:$0xff] }
  0xa8   : > { %819 = vmatpush2.msra.mxu0 %v562_v23  ;;  %v937_v23 = vld [vmem:[#allocation4 + $0x210] sm:$0xff]  ;;  %1100 = vmatpush1.msra.mxu1 %v877_v20  ;;  %v970_v20 = vld [vmem:[#allocation4 + $0x318] sm:$0xff] }
  0xa9   : > { %820 = vmatprep.subr.mxu0 %v561_v25  ;;  %v875_v25 = vld [vmem:[#allocation4 + $0x20] sm:$0xff]  ;;  %1101 = vmatprep.subr.mxu1 %v876_v22  ;;  %v969_v22 = vld [vmem:[#allocation4 + $0x310] sm:$0xff] }
  0xaa   : > { %821 = vmatpush2.msra.mxu0 %v560_v26  ;;  %v936_v26 = vld [vmem:[#allocation4 + $0x208] sm:$0xff]  ;;  %1102 = vmatpush1.msra.mxu1 %v875_v25 }
  0xab   : > { %823 = vmatmul.mubr.f32.vlgmr.msra.gmra.mxu0 %v390_v27  ;;  %1152 = vmatprep.subr.mxu0 %v966_v28  ;;  %v874_v27 = vld [vmem:[#allocation4 + $0x18] sm:$0xff]  ;;  %v968_v25 = vld [vmem:[#allocation4 + $0x308] sm:$0xff] }
  0xac   : > { %1500 = vmatprep.mubr.msk.f32.mxu0 %vm395_vm3, %v393_v55  ;;  %1153 = vmatpush1.msra.mxu0 %v965_v48  ;;  %v935_v55 = vld [vmem:[#allocation4 + $0x200] sm:$0xff]  ;;  %v998_v28 = vld [vmem:[#allocation4 + $0x3f8] sm:$0xff]  ;;  %v872_v48 = vld [vmem:[#allocation4 + $0x8] sm:$0xff] }
  0xad   : > { %1154 = vmatprep.subr.mxu0 %v964_v29  ;;  %v997_v29 = vld [vmem:[#allocation4 + $0x3f0] sm:$0xff]  ;;  %1103 = vmatprep.subr.mxu1 %v874_v27  ;;  %v967_v27 = vld [vmem:[#allocation4 + $0x300] sm:$0xff] }
  0xae   : > { %1155 = vmatpush1.msra.mxu0 %v963_v49  ;;  %v871_v49 = vld [vmem:[#allocation4] sm:$0xff] }
  0xaf   : > { %1501 = vmatmul.mubr.msk.f32.gmra.mxu0 %vm395_vm3, %v392_v56  ;;  %1156 = vmatprep.subr.mxu0 %v962_v17  ;;  %v873_v56 = vld [vmem:[#allocation4 + $0x10] sm:$0xff]  ;;  %v996_v17 = vld [vmem:[#allocation4 + $0x3e8] sm:$0xff] }
  0xb0   : > { %1157 = vmatpush1.msra.mxu0 %v961_v31  ;;  %1104 = vmatpush1.msra.mxu1 %v873_v56  ;;  %v933_v31 = vld [vmem:[#allocation4 + $0x1f0] sm:$0xff]  ;;  %v907_v56 = vld [vmem:[#allocation4 + $0x120] sm:$0xff] }
  0xb1   : > { %1158 = vmatprep.subr.mxu0 %v960_v33  ;;  %1105 = vmatprep.subr.mxu1 %v872_v48  ;;  %v932_v33 = vld [vmem:[#allocation4 + $0x1e8] sm:$0xff]  ;;  %v905_v48 = vld [vmem:[#allocation4 + $0x110] sm:$0xff] }
  0xb2   : > { %1159 = vmatpush1.msra.mxu0 %v959_v36  ;;  %1106 = vmatpush1.msra.mxu1 %v871_v49  ;;  %v992_v36 = vld [vmem:[#allocation4 + $0x3c8] sm:$0xff]  ;;  %v903_v49 = vld [vmem:[#allocation4 + $0x100] sm:$0xff] }
  0xb3   : > { %1160 = vmatprep.subr.mxu0 %v958_v38  ;;  %1107 = vmatprep.subr.mxu1 %v934_v18  ;;  %v991_v38 = vld [vmem:[#allocation4 + $0x3c0] sm:$0xff]  ;;  %v1813_v18 = vsub.s32 0, %v1753_v50 }
  0xb4   : > { %1161 = vmatpush1.msra.mxu0 %v957_v40  ;;  %1108 = vmatpush2.msra.mxu1 %v933_v31  ;;  %v990_v40 = vld [vmem:[#allocation4 + $0x3b8] sm:$0xff]  ;;  %v592_v31 = vld [vmem:[%s1926_s2] sm:$0x3] }
  0xb5   : > { %1162 = vmatprep.subr.mxu0 %v956_v42  ;;  %1109 = vmatprep.subr.mxu1 %v932_v33  ;;  %v989_v42 = vld [vmem:[#allocation4 + $0x3b0] sm:$0xff]  ;;  %v597_v33 = vrot.slane %v592_v31, %v1813_v18 }
  0xb6   : > { %1163 = vmatpush1.msra.mxu0 %v955_v44  ;;  %1110 = vmatpush2.msra.mxu1 %v931_v35  ;;  %v988_v44 = vld [vmem:[#allocation4 + $0x3a8] sm:$0xff] }
  0xb7   : > { %1164 = vmatprep.subr.mxu0 %v954_v46  ;;  %1111 = vmatprep.subr.mxu1 %v930_v37  ;;  %v987_v46 = vld [vmem:[#allocation4 + $0x3a0] sm:$0xff] }
  0xb8   : > { %1165 = vmatpush1.msra.mxu0 %v953_v51  ;;  %1112 = vmatpush2.msra.mxu1 %v929_v39  ;;  %v986_v51 = vld [vmem:[#allocation4 + $0x398] sm:$0xff] }
  0xb9   : > { %1166 = vmatprep.subr.mxu0 %v952_v53  ;;  %1113 = vmatprep.subr.mxu1 %v928_v41  ;;  %v985_v53 = vld [vmem:[#allocation4 + $0x390] sm:$0xff] }
  0xba   : > { %1167 = vmatpush1.msra.mxu0 %v951_v57  ;;  %1114 = vmatpush2.msra.mxu1 %v927_v43  ;;  %v984_v57 = vld [vmem:[#allocation4 + $0x388] sm:$0xff] }
  0xbb   : > { %1168 = vmatprep.subr.mxu0 %v950_v59  ;;  %1115 = vmatprep.subr.mxu1 %v926_v45  ;;  %v983_v59 = vld [vmem:[#allocation4 + $0x380] sm:$0xff] }
  0xbc   : > { %1169 = vmatpush1.msra.mxu0 %v949_v61  ;;  %1116 = vmatpush2.msra.mxu1 %v925_v47  ;;  %v982_v61 = vld [vmem:[#allocation4 + $0x378] sm:$0xff] }
  0xbd   : > { %1170 = vmatprep.subr.mxu0 %v948_v63  ;;  %1117 = vmatprep.subr.mxu1 %v924_v52  ;;  %v981_v63 = vld [vmem:[#allocation4 + $0x370] sm:$0xff] }
  0xbe   : > { %1171 = vmatpush1.msra.mxu0 %v947_v1  ;;  %1118 = vmatpush2.msra.mxu1 %v923_v54  ;;  %v980_v1 = vld [vmem:[#allocation4 + $0x368] sm:$0xff] }
  0xbf   : > { %1172 = vmatprep.subr.mxu0 %v946_v3  ;;  %1119 = vmatprep.subr.mxu1 %v922_v58  ;;  %v979_v3 = vld [vmem:[#allocation4 + $0x360] sm:$0xff] }
  0xc0   : > { %1173 = vmatpush1.msra.mxu0 %v945_v5  ;;  %1120 = vmatpush2.msra.mxu1 %v921_v60  ;;  %v977_v5 = vld [vmem:[#allocation4 + $0x350] sm:$0xff] }
  0xc1   : > { %1174 = vmatprep.subr.mxu0 %v944_v7  ;;  %1121 = vmatprep.subr.mxu1 %v920_v62  ;;  %v917_v7 = vld [vmem:[#allocation4 + $0x170] sm:$0xff] }
  0xc2   : > { %1175 = vmatpush1.msra.mxu0 %v943_v9  ;;  %1122 = vmatpush2.msra.mxu1 %v919_v0  ;;  %v916_v9 = vld [vmem:[#allocation4 + $0x168] sm:$0xff] }
  0xc3   : > { %1176 = vmatprep.subr.mxu0 %v942_v11  ;;  %1123 = vmatprep.subr.mxu1 %v918_v2  ;;  %v915_v11 = vld [vmem:[#allocation4 + $0x160] sm:$0xff] }
  0xc4   : > { %1177 = vmatpush1.msra.mxu0 %v941_v13  ;;  %1124 = vmatpush2.msra.mxu1 %v917_v7  ;;  %v914_v13 = vld [vmem:[#allocation4 + $0x158] sm:$0xff] }
  0xc5   : > { %1178 = vmatprep.subr.mxu0 %v940_v15  ;;  %1125 = vmatprep.subr.mxu1 %v916_v9  ;;  %v913_v15 = vld [vmem:[#allocation4 + $0x150] sm:$0xff] }
  0xc6   : > { %1179 = vmatpush1.msra.mxu0 %v939_v19  ;;  %1126 = vmatpush2.msra.mxu1 %v915_v11  ;;  %v912_v19 = vld [vmem:[#allocation4 + $0x148] sm:$0xff] }
  0xc7   : > { %1180 = vmatprep.subr.mxu0 %v938_v21  ;;  %1127 = vmatprep.subr.mxu1 %v914_v13  ;;  %v911_v21 = vld [vmem:[#allocation4 + $0x140] sm:$0xff] }
  0xc8   : > { %1181 = vmatpush1.msra.mxu0 %v937_v23  ;;  %1128 = vmatpush2.msra.mxu1 %v913_v15  ;;  %v910_v23 = vld [vmem:[#allocation4 + $0x138] sm:$0xff] }
  0xc9   : > { %1182 = vmatprep.subr.mxu0 %v936_v26  ;;  %1129 = vmatprep.subr.mxu1 %v912_v19  ;;  %v909_v26 = vld [vmem:[#allocation4 + $0x130] sm:$0xff] }
  0xca   : > { %1183 = vmatpush1.msra.mxu0 %v935_v55  ;;  %1130 = vmatpush2.msra.mxu1 %v911_v21  ;;  %v908_v55 = vld [vmem:[#allocation4 + $0x128] sm:$0xff] }
  0xcb   : > { %1184 = vmatprep.subr.mxu0 %v998_v28  ;;  %1131 = vmatprep.subr.mxu1 %v910_v23  ;;  %v906_v28 = vld [vmem:[#allocation4 + $0x118] sm:$0xff]  ;;  %v1027_v23 = vld [vmem:[#allocation4 + $0x4e0] sm:$0xff] }
  0xcc   : > { %1185 = vmatpush2.msra.mxu0 %v997_v29  ;;  %1132 = vmatpush2.msra.mxu1 %v909_v26  ;;  %v904_v29 = vld [vmem:[#allocation4 + $0x108] sm:$0xff] }
  0xcd   : > { %1186 = vmatprep.subr.mxu0 %v996_v17  ;;  %1133 = vmatprep.subr.mxu1 %v908_v55  ;;  %v1030_v17 = vld [vmem:[#allocation4 + $0x4f8] sm:$0xff] }
  0xce   : > { %1187 = vmatpush2.msra.mxu0 %v995_v30  ;;  %1134 = vmatpush2.msra.mxu1 %v907_v56  ;;  %v1024_v56 = vld [vmem:[#allocation4 + $0x4c8] sm:$0xff] }
  0xcf   : > { %1188 = vmatprep.subr.mxu0 %v994_v32  ;;  %1135 = vmatprep.subr.mxu1 %v906_v28  ;;  %v1819_v32 = vsub.s32 1, %v1753_v50 }
  0xd0   : > { %1189 = vmatpush2.msra.mxu0 %v993_v34  ;;  %1136 = vmatpush2.msra.mxu1 %v905_v48  ;;  %v1023_v48 = vld [vmem:[#allocation4 + $0x4c0] sm:$0xff] }
  0xd1   : > { %1190 = vmatprep.subr.mxu0 %v992_v36  ;;  %1137 = vmatprep.subr.mxu1 %v904_v29  ;;  %v601_v36 = vrot.slane %v592_v31, %v1819_v32  ;;  %v1022_v29 = vld [vmem:[#allocation4 + $0x4b8] sm:$0xff] }
  0xd2   : > { %1191 = vmatpush2.msra.mxu0 %v991_v38  ;;  %1138 = vmatpush2.msra.mxu1 %v903_v49  ;;  %v1021_v49 = vld [vmem:[#allocation4 + $0x4b0] sm:$0xff]  ;;  %v1018_v31 = vld [vmem:[#allocation4 + $0x498] sm:$0xff] }
  0xd3   : > { %1192 = vmatprep.subr.mxu0 %v990_v40  ;;  %1229 = vmatprep.subr.mxu1 %v1030_v17  ;;  %v1020_v17 = vld [vmem:[#allocation4 + $0x4a8] sm:$0xff] }
  0xd4   : > { %1193 = vmatpush2.msra.mxu0 %v989_v42 }
  0xd5   : > { %1194 = vmatprep.subr.mxu0 %v988_v44 }
  0xd6   : > { %1195 = vmatpush2.msra.mxu0 %v987_v46 }
  0xd7   : > { %1196 = vmatprep.subr.mxu0 %v986_v51 }
  0xd8   : > { %1197 = vmatpush2.msra.mxu0 %v985_v53 }
  0xd9   : > { %1198 = vmatprep.subr.mxu0 %v984_v57 }
  0xda   : > { %1199 = vmatpush2.msra.mxu0 %v983_v59 }
  0xdb   : > { %1200 = vmatprep.subr.mxu0 %v982_v61 }
  0xdc   : > { %1201 = vmatpush2.msra.mxu0 %v981_v63 }
  0xdd   : > { %1202 = vmatprep.subr.mxu0 %v980_v1 }
  0xde   : > { %1203 = vmatpush2.msra.mxu0 %v979_v3 }
  0xdf   : > { %1204 = vmatprep.subr.mxu0 %v978_v4 }
  0xe0   : > { %1205 = vmatpush2.msra.mxu0 %v977_v5 }
  0xe1   : > { %1206 = vmatprep.subr.mxu0 %v976_v6 }
  0xe2   : > { %1207 = vmatpush2.msra.mxu0 %v975_v8 }
  0xe3   : > { %1208 = vmatprep.subr.mxu0 %v974_v10 }
  0xe4   : > { %1209 = vmatpush2.msra.mxu0 %v973_v12 }
  0xe5   : > { %1210 = vmatprep.subr.mxu0 %v972_v14 }
  0xe6   : > { %1211 = vmatpush2.msra.mxu0 %v971_v16  ;;  %v1029_v16 = vld [vmem:[#allocation4 + $0x4f0] sm:$0xff] }
  0xe7   : > { %1212 = vmatprep.subr.mxu0 %v970_v20  ;;  %v1028_v20 = vld [vmem:[#allocation4 + $0x4e8] sm:$0xff] }
  0xe8   : > { %1213 = vmatpush2.msra.mxu0 %v969_v22 }
  0xe9   : > { %1214 = vmatprep.subr.mxu0 %v968_v25  ;;  %v1026_v25 = vld [vmem:[#allocation4 + $0x4d8] sm:$0xff] }
  0xea   : > { %1215 = vmatpush2.msra.mxu0 %v967_v27  ;;  %v1025_v27 = vld [vmem:[#allocation4 + $0x4d0] sm:$0xff] }
 0x12a   : > { %v670_v30 = vpop.f32.mrf.mxu0 }
 0x12b   : > { %v671_v38 = vadd.f32 %v670_v30, %v597_v33  ;;  %v1019_v30 = vld [vmem:[#allocation4 + $0x4a0] sm:$0xff] }
 0x12c   : > { %v672_v34 = vpop.f32.mrf.mxu0 }
 0x12d   : > { %v747_v35 = vpop.f32.mrf.mxu1  ;;  %v673_v40 = vadd.f32 %v672_v34, %v601_v36  ;;  %v1016_v34 = vld [vmem:[#allocation4 + $0x488] sm:$0xff] }
 0x12e   : > { %v748_v43 = vadd.f32 %v747_v35, %v671_v38  ;;  %v1015_v35 = vld [vmem:[#allocation4 + $0x480] sm:$0xff]  ;;  %v1012_v38 = vld [vmem:[#allocation4 + $0x468] sm:$0xff] }
 0x12f   : > { %v676_v37 = vpop.f32.mrf.mxu0  ;;  %v749_v39 = vpop.f32.mrf.mxu1 }
 0x130   : > { %v677_v44 = vadd.f32 %v676_v37, %v597_v33  ;;  %v750_v47 = vadd.f32 %v749_v39, %v673_v40  ;;  %v1017_v33 = vld [vmem:[#allocation4 + $0x490] sm:$0xff]  ;;  %v1011_v39 = vld [vmem:[#allocation4 + $0x460] sm:$0xff]  ;;  %v1010_v40 = vld [vmem:[#allocation4 + $0x458] sm:$0xff] }
 0x131   : > { %v678_v41 = vpop.f32.mrf.mxu0  ;;  %v753_v42 = vpop.f32.mrf.mxu1  ;;  %v1013_v37 = vld [vmem:[#allocation4 + $0x470] sm:$0xff] }
 0x132   : > { %v679_v45 = vadd.f32 %v678_v41, %v601_v36  ;;  %v754_v54 = vadd.f32 %v753_v42, %v677_v44  ;;  %v1014_v36 = vld [vmem:[#allocation4 + $0x478] sm:$0xff]  ;;  %v1009_v41 = vld [vmem:[#allocation4 + $0x450] sm:$0xff]  ;;  %v1008_v42 = vld [vmem:[#allocation4 + $0x448] sm:$0xff] }
 0x133   : > { %v755_v51 = vpop.f32.mrf.mxu1  ;;  %v1006_v44 = vld [vmem:[#allocation4 + $0x438] sm:$0xff] }
 0x134   : > { %v756_v58 = vadd.f32 %v755_v51, %v679_v45  ;;  %v1005_v45 = vld [vmem:[#allocation4 + $0x430] sm:$0xff]  ;;  %v1002_v51 = vld [vmem:[#allocation4 + $0x418] sm:$0xff] }
 0x16b   : > { %v824_v46 = vpop.f32.mrf.mxu0 }
 0x16c   : > { %v825_v52 = vadd.f32 %v824_v46, %v748_v43  ;;  %v1007_v43 = vld [vmem:[#allocation4 + $0x440] sm:$0xff]  ;;  %v1004_v46 = vld [vmem:[#allocation4 + $0x428] sm:$0xff] }
 0x16d   : > { %v826_v53 = vpop.f32.mrf.mxu0 }
 0x16e   : > { %v827_v57 = vadd.f32 %v826_v53, %v750_v47  ;;  %v839_v59 = vmul.f32 0.1, %v825_v52  ;;  %vm835_vm4 = vcmp.gt.f32.partialorder %v825_v52, 0.0  ;;  %v1003_v47 = vld [vmem:[#allocation4 + $0x420] sm:$0xff]  ;;  %v1000_v53 = vld [vmem:[#allocation4 + $0x408] sm:$0xff] }
 0x16f   : > { %v830_v60 = vpop.f32.mrf.mxu0 }
 0x170   : > { %v840_v61 = vmul.f32 0.1, %v827_v57  ;;  %v831_v62 = vadd.f32 %v830_v60, %v754_v54  ;;  %vm836_vm5 = vcmp.gt.f32.partialorder %v827_v57, 0.0  ;;  %v843_v3 = vsel %vm835_vm4, %v825_v52, %v839_v59  ;;  %v1001_v52 = vld [vmem:[#allocation4 + $0x410] sm:$0xff]  ;;  %v999_v54 = vld [vmem:[#allocation4 + $0x400] sm:$0xff]  ;;  %v1060_v59 = vld [vmem:[#allocation4 + $0x5e8] sm:$0xff] }
 0x171   : > { %v832_v63 = vpop.f32.mrf.mxu0  ;;  %v859_v7 = vrot.slane %v843_v3, 1  ;;  %v847_v12 = vrot.slane %v843_v3, 7  ;;  %v1059_v60 = vld [vmem:[#allocation4 + $0x5e0] sm:$0xff] }
 0x172   : > { %v841_v0 = vmul.f32 0.1, %v831_v62  ;;  %v833_v1 = vadd.f32 %v832_v63, %v756_v58  ;;  %v1823_v2 = vsel %vm836_vm5, %v827_v57, %v840_v61  ;;  %vm837_vm6 = vcmp.gt.f32.partialorder %v831_v62, 0.0  ;;  %v1062_v57 = vld [vmem:[#allocation4 + $0x5f8] sm:$0xff]  ;;  %v1061_v58 = vld [vmem:[#allocation4 + $0x5f0] sm:$0xff]  ;;  %v1056_v63 = vld [vmem:[#allocation4 + $0x5c8] sm:$0xff] }
 0x173   : > { %1216 = vmatprep.mubr.f32.mxu0 %v1823_v2  ;;  %v848_v10 = vrot.slane %v1823_v2, 7  ;;  %v860_v26 = vrot.slane %v1823_v2, 1  ;;  %v1058_v61 = vld [vmem:[#allocation4 + $0x5d8] sm:$0xff] }
 0x174   : > { %v842_v4 = vmul.f32 0.1, %v833_v1  ;;  %1217 = vmatmul.mubr.f32.vlgmr.msra.gmra.mxu0 %v843_v3  ;;  %vm838_vm7 = vcmp.gt.f32.partialorder %v833_v1, 0.0  ;;  %v845_v5 = vsel %vm837_vm6, %v831_v62, %v841_v0  ;;  %v1057_v62 = vld [vmem:[#allocation4 + $0x5d0] sm:$0xff]  ;;  %v1055_v0 = vld [vmem:[#allocation4 + $0x5c0] sm:$0xff] }
 0x175   : > { %v861_v6 = vrot.slane %v845_v5, 1  ;;  %v849_v9 = vrot.slane %v845_v5, 7  ;;  %v1053_v3 = vld [vmem:[#allocation4 + $0x5b0] sm:$0xff] }
 0x176   : > { %v1826_v8 = vsel %vm838_vm7, %v833_v1, %v842_v4  ;;  %v1054_v1 = vld [vmem:[#allocation4 + $0x5b8] sm:$0xff]  ;;  %v1052_v4 = vld [vmem:[#allocation4 + $0x5a8] sm:$0xff] }
 0x177   : > { %v850_v11 = vrot.slane %v1826_v8, 7  ;;  %1222 = vmatprep.mubr.f32.mxu0 %v1826_v8  ;;  %v1833_v13 = vsel %vm389_vm2, %v859_v7, %v861_v6  ;;  %v1837_v14 = vsel %vm389_vm2, %v861_v6, %v859_v7  ;;  %v853_v19 = vsel %vm373_vm0, %v849_v9, %v847_v12  ;;  %v1050_v6 = vld [vmem:[#allocation4 + $0x598] sm:$0xff]  ;;  %v1049_v7 = vld [vmem:[#allocation4 + $0x590] sm:$0xff] }
 0x178   : > { %1223 = vmatmul.mubr.f32.gmra.mxu0 %v845_v5  ;;  %v862_v21 = vrot.slane %v1826_v8, 1  ;;  %v851_v55 = vsel %vm373_vm0, %v847_v12, %v849_v9  ;;  %v1051_v5 = vld [vmem:[#allocation4 + $0x5a0] sm:$0xff]  ;;  %v1048_v9 = vld [vmem:[#allocation4 + $0x588] sm:$0xff]  ;;  %v1045_v12 = vld [vmem:[#allocation4 + $0x570] sm:$0xff] }
 0x179   : > { %v854_v15 = vsel %vm373_vm0, %v850_v11, %v848_v10  ;;  %v852_v22 = vsel %vm373_vm0, %v848_v10, %v850_v11  ;;  %v1047_v10 = vld [vmem:[#allocation4 + $0x580] sm:$0xff]  ;;  %v1046_v11 = vld [vmem:[#allocation4 + $0x578] sm:$0xff] }
 0x17a   : > { %1502 = vmatprep.mubr.msk.f32.mxu1 %vm379_vm1, %v854_v15  ;;  %v864_v28 = vsel %vm389_vm2, %v860_v26, %v862_v21  ;;  %v1044_v15 = vld [vmem:[#allocation4 + $0x568] sm:$0xff] }
 0x17b   : > { %1503 = vmatmul.mubr.msk.f32.vlgmr.msra.gmra.mxu1 %vm379_vm1, %v853_v19  ;;  %v1042_v19 = vld [vmem:[#allocation4 + $0x558] sm:$0xff] }
 0x17c   : > { %1230 = vmatpush1.msra.mxu1 %v1029_v16  ;;  %1145 = vmatprep.mubr.f32.mxu1 %v852_v22  ;;  %v1043_v16 = vld [vmem:[#allocation4 + $0x560] sm:$0xff]  ;;  %v1040_v22 = vld [vmem:[#allocation4 + $0x548] sm:$0xff] }
 0x17d   : > { %1231 = vmatprep.subr.mxu1 %v1028_v20  ;;  %v1041_v20 = vld [vmem:[#allocation4 + $0x550] sm:$0xff] }
 0x17e   : > { %1232 = vmatpush1.msra.mxu1 %v1027_v23  ;;  %v1039_v23 = vld [vmem:[#allocation4 + $0x540] sm:$0xff] }
 0x17f   : > { %1233 = vmatprep.subr.mxu1 %v1026_v25  ;;  %1146 = vmatmul.mubr.f32.gmra.mxu1 %v851_v55  ;;  %v1038_v25 = vld [vmem:[#allocation4 + $0x538] sm:$0xff]  ;;  %v1036_v55 = vld [vmem:[#allocation4 + $0x528] sm:$0xff] }
 0x180   : > { %1234 = vmatpush1.msra.mxu1 %v1025_v27  ;;  %1293 = vmatprep.mubr.f32.mxu1 %v864_v28  ;;  %v1037_v27 = vld [vmem:[#allocation4 + $0x530] sm:$0xff]  ;;  %v1034_v28 = vld [vmem:[#allocation4 + $0x518] sm:$0xff] }
 0x181   : > { %1235 = vmatprep.subr.mxu1 %v1024_v56  ;;  %v1035_v56 = vld [vmem:[#allocation4 + $0x520] sm:$0xff] }
 0x182   : > { %1236 = vmatpush1.msra.mxu1 %v1023_v48  ;;  %v1033_v48 = vld [vmem:[#allocation4 + $0x510] sm:$0xff] }
 0x183   : > { %1237 = vmatprep.subr.mxu1 %v1022_v29  ;;  %v1032_v29 = vld [vmem:[#allocation4 + $0x508] sm:$0xff] }
 0x184   : > { %1238 = vmatpush1.msra.mxu1 %v1021_v49  ;;  %v1031_v49 = vld [vmem:[#allocation4 + $0x500] sm:$0xff] }
 0x185   : > { %1239 = vmatprep.subr.mxu1 %v1020_v17  ;;  %v866_v17 = vsel %vm389_vm2, %v862_v21, %v860_v26 }
 0x186   : > { %1240 = vmatpush1.msra.mxu1 %v1019_v30 }
 0x187   : > { %1241 = vmatprep.subr.mxu1 %v1018_v31 }
 0x188   : > { %1242 = vmatpush1.msra.mxu1 %v1017_v33 }
 0x189   : > { %1243 = vmatprep.subr.mxu1 %v1016_v34 }
 0x18a   : > { %1244 = vmatpush1.msra.mxu1 %v1015_v35 }
 0x18b   : > { %1245 = vmatprep.subr.mxu1 %v1014_v36 }
 0x18c   : > { %1246 = vmatpush1.msra.mxu1 %v1013_v37 }
 0x18d   : > { %1247 = vmatprep.subr.mxu1 %v1012_v38 }
 0x18e   : > { %1248 = vmatpush1.msra.mxu1 %v1011_v39 }
 0x18f   : > { %1249 = vmatprep.subr.mxu1 %v1010_v40 }
 0x190   : > { %1250 = vmatpush1.msra.mxu1 %v1009_v41 }
 0x191   : > { %1251 = vmatprep.subr.mxu1 %v1008_v42 }
 0x192   : > { %1252 = vmatpush1.msra.mxu1 %v1007_v43 }
 0x193   : > { %1253 = vmatprep.subr.mxu1 %v1006_v44 }
 0x194   : > { %1254 = vmatpush1.msra.mxu1 %v1005_v45 }
 0x195   : > { %1255 = vmatprep.subr.mxu1 %v1004_v46 }
 0x196   : > { %1256 = vmatpush1.msra.mxu1 %v1003_v47 }
 0x197   : > { %1257 = vmatprep.subr.mxu1 %v1002_v51 }
 0x198   : > { %1258 = vmatpush1.msra.mxu1 %v1001_v52 }
 0x199   : > { %1259 = vmatprep.subr.mxu1 %v1000_v53 }
 0x19a   : > { %1260 = vmatpush1.msra.mxu1 %v999_v54 }
 0x19b   : > { %1261 = vmatprep.subr.mxu1 %v1062_v57 }
 0x19c   : > { %1262 = vmatpush2.msra.mxu1 %v1061_v58 }
 0x19d   : > { %1263 = vmatprep.subr.mxu1 %v1060_v59 }
 0x19e   : > { %1264 = vmatpush2.msra.mxu1 %v1059_v60 }
 0x19f   : > { %1265 = vmatprep.subr.mxu1 %v1058_v61 }
 0x1a0   : > { %1266 = vmatpush2.msra.mxu1 %v1057_v62 }
 0x1a1   : > { %1267 = vmatprep.subr.mxu1 %v1056_v63 }
 0x1a2   : > { %1268 = vmatpush2.msra.mxu1 %v1055_v0  ;;  %v1320_v0 = vld [vmem:[%s1929_s5] sm:$0xff] }
 0x1a3   : > { %1269 = vmatprep.subr.mxu1 %v1054_v1 }
 0x1a4   : > { %1270 = vmatpush2.msra.mxu1 %v1053_v3 }
 0x1a5   : > { %1271 = vmatprep.subr.mxu1 %v1052_v4 }
 0x1a6   : > { %1272 = vmatpush2.msra.mxu1 %v1051_v5 }
 0x1a7   : > { %1273 = vmatprep.subr.mxu1 %v1050_v6  ;;  %v1322_v6 = vcombine.high %v1320_v0, %v1320_v0 }
 0x1a8   : > { %1274 = vmatpush2.msra.mxu1 %v1049_v7 }
 0x1a9   : > { %1275 = vmatprep.subr.mxu1 %v1048_v9 }
 0x1aa   : > { %1276 = vmatpush2.msra.mxu1 %v1047_v10 }
 0x1ab   : > { %1277 = vmatprep.subr.mxu1 %v1046_v11 }
 0x1ac   : > { %1278 = vmatpush2.msra.mxu1 %v1045_v12 }
 0x1ad   : > { %1279 = vmatprep.subr.mxu1 %v1044_v15 }
 0x1ae   : > { %1280 = vmatpush2.msra.mxu1 %v1043_v16  ;;  %v1631_v16 = vmov 0  }
 0x1af   : > { %1281 = vmatprep.subr.mxu1 %v1042_v19  ;;  %1544 = vset.pattern.permute.xlu0 %v1631_v16  ;;  %v1332_v19 = vld [vmem:[%s1930_s6] sm:$0xf] }
 0x1b0   : > { %1282 = vmatpush2.msra.mxu1 %v1041_v20 }
 0x1b1   : > { %1283 = vmatprep.subr.mxu1 %v1040_v22 }
 0x1b2   : > { %1284 = vmatpush2.msra.mxu1 %v1039_v23 }
 0x1b3   : > { %1285 = vmatprep.subr.mxu1 %v1038_v25 }
 0x1b4   : > { %1286 = vmatpush2.msra.mxu1 %v1037_v27  ;;  %v1337_v27 = vld [vmem:[%s1931_s7] sm:$0xff] }
 0x1b5   : > { %1287 = vmatprep.subr.mxu1 %v1036_v55  ;;  %v1344_v55 = vcombine.high %v1337_v27, %v1337_v27 }
 0x1b6   : > { %1288 = vmatpush2.msra.mxu1 %v1035_v56 }
 0x1b7   : > { %1289 = vmatprep.subr.mxu1 %v1034_v28 }
 0x1b8   : > { %1290 = vmatpush2.msra.mxu1 %v1033_v48 }
 0x1b9   : > { %1291 = vmatprep.subr.mxu1 %v1032_v29 }
 0x1ba   : > { %1292 = vmatpush2.msra.mxu1 %v1031_v49 }
 0x1bb   : > { %1294 = vmatmul.mubr.f32.vlgmr.msra.gmra.mxu1 %v1833_v13  ;;  %v1063_v13 = vld [vmem:[%s1928_s4] sm:$0x3] }
 0x1bc   : > { %1504 = vmatprep.mubr.msk.f32.mxu1 %vm395_vm3, %v866_v17  ;;  %v1068_v8 = vrot.slane %v1063_v13, %v1813_v18  ;;  %v1072_v50 = vrot.slane %v1063_v13, %v1819_v32 }
 0x1bf   : > { %1505 = vmatmul.mubr.msk.f32.gmra.mxu1 %vm395_vm3, %v1837_v14 }
 0x234   : > { %v1218_v33 = vpop.f32.mrf.mxu0 }
 0x236   : > { %v1220_v34 = vpop.f32.mrf.mxu0 }
 0x238   : > { %v1224_v36 = vpop.f32.mrf.mxu0 }
 0x23a   : > { %v1226_v41 = vpop.f32.mrf.mxu0 }
 0x23b   : > { %v1141_v30 = vpop.f32.mrf.mxu1 }
 0x23c   : > { %v1142_v26 = vadd.f32 %v1141_v30, %v1068_v8 }
 0x23d   : > { %v1143_v31 = vpop.f32.mrf.mxu1 }
 0x23e   : > { %v1144_v24 = vadd.f32 %v1143_v31, %v1072_v50  ;;  %v1219_v39 = vadd.f32 %v1218_v33, %v1142_v26 }
 0x23f   : > { %v1147_v2 = vpop.f32.mrf.mxu1 }
 0x240   : > { %v1148_v35 = vadd.f32 %v1147_v2, %v1068_v8  ;;  %v1221_v44 = vadd.f32 %v1220_v34, %v1144_v24  ;;  %v1362_v8 = vld [vmem:[%s1932_s8] sm:$0x3] }
 0x241   : > { %v1149_v21 = vpop.f32.mrf.mxu1  ;;  %v1371_v26 = vrot.slane %v1362_v8, %v1819_v32 }
 0x242   : > { %v1150_v14 = vadd.f32 %v1149_v21, %v1072_v50  ;;  %v1225_v40 = vadd.f32 %v1224_v36, %v1148_v35  ;;  %v1367_v21 = vrot.slane %v1362_v8, %v1813_v18 }
 0x244   : > { %v1227_v46 = vadd.f32 %v1226_v41, %v1150_v14 }
 0x27b   : > { %v1295_v37 = vpop.f32.mrf.mxu1 }
 0x27c   : > { %v1876_v43 = vadd.f32 %v1295_v37, %v1219_v39 }
 0x27d   : > { %v1297_v38 = vpop.f32.mrf.mxu1 }
 0x27e   : > { %v1880_v51 = vadd.f32 %v1297_v38, %v1221_v44 }
 0x27f   : > { %v1301_v42 = vpop.f32.mrf.mxu1 }
 0x280   : > { %v1878_v45 = vadd.f32 %v1301_v42, %v1225_v40 }
 0x281   : > { %v1303_v47 = vpop.f32.mrf.mxu1 }
 0x282   : > { %v1306_v52 = vadd.f32 %v1878_v45, %v1876_v43  ;;  %v1884_v53 = vadd.f32 %v1303_v47, %v1227_v46 }
 0x284   : > { %v1307_v54 = vrot.slane %v1306_v52, 4  ;;  %v1313_v57 = vadd.f32 %v1884_v53, %v1880_v51 }
 0x286   : > { %v1308_v58 = vadd.f32 %v1307_v54, %v1306_v52  ;;  %v1314_v59 = vrot.slane %v1313_v57, 4 }
 0x288   : > { %v1309_v60 = vrot.slane %v1308_v58, 2  ;;  %v1315_v61 = vadd.f32 %v1314_v59, %v1313_v57 }
 0x28a   : > { %v1310_v62 = vadd.f32 %v1309_v60, %v1308_v58  ;;  %v1316_v63 = vrot.slane %v1315_v61, 2 }
 0x28c   : > { %v1317_v1 = vadd.f32 %v1316_v63, %v1315_v61  ;;  %v1311_v3 = vrot.slane %v1310_v62, 1  ;;  %v1555_v61 = vld [vmem:[%s1745_s28] sm:$0xff]  ;;  %v1556_v63 = vld [vmem:[%s1745_s28 + $0x10] sm:$0xff] }
 0x28e   : > { %v1312_v4 = vadd.f32 %v1311_v3, %v1310_v62  ;;  %v1318_v5 = vrot.slane %v1317_v1, 1 }
 0x290   : > { %v1319_v7 = vadd.f32 %v1318_v5, %v1317_v1  ;;  %v1324_v9 = vmul.f32 %v1320_v0, %v1312_v4  ;;  %v1557_v1 = vld [vmem:[%s1745_s28 + $0x8] sm:$0xff] }
 0x292   : > { %v1325_v10 = vmul.f32 %v1322_v6, %v1319_v7  ;;  %v1327_v11 = vsel %vm1326_vm8, %v1324_v9, 0.0 }
 0x294   : > { %v1328_v12 = vsel %vm1326_vm8, %v1325_v10, 0.0 }
 0x295   : > { %v1329_v15 = vadd.f32 %v1328_v12, %v1327_v11 }
 0x297   : > { %1330 = vadd.xlane.f32.xlu0 %v1329_v15 }
 0x320   : > { %v1331_v20 = vpop.xlane.xlu0 %1330 }
 0x321   : > { %v1333_v22 = vadd.f32 %v1332_v19, %v1331_v20 }
 0x323   : > { %v1335_v23 = vmul.f32 0.1, %v1333_v22  ;;  %vm1334_vm9 = vcmp.gt.f32.partialorder %v1333_v22, 0.0 }
 0x325   : > { %v1336_v25 = vsel %vm1334_vm9, %v1333_v22, %v1335_v23 }
 0x326   : > { %1340 = vperm.xlu0 %1544, %v1336_v25  }
 0x3a1   : > { %v1341_v56 = vpop.permute.xlu0 %1340 }
 0x3a2   : > { %v1346_v28 = vmul.f32 %v1341_v56, %v1337_v27  ;;  %v1347_v48 = vmul.f32 %v1344_v55, %v1341_v56 }
 0x3a4   : > { %v1348_v29 = vsel %vm1326_vm8, %v1346_v28, 0.0  ;;  %v1355_v49 = vsel %vm1326_vm8, %v1347_v48, 0.0 }
 0x3a5   : > { %v1349_v17 = vrot.slane %v1348_v29, 4  ;;  %v1356_v30 = vrot.slane %v1355_v49, 4 }
 0x3a7   : > { %v1350_v31 = vadd.f32 %v1349_v17, %v1348_v29  ;;  %v1357_v33 = vadd.f32 %v1356_v30, %v1355_v49 }
 0x3a9   : > { %v1351_v13 = vrot.slane %v1350_v31, 2  ;;  %v1358_v2 = vrot.slane %v1357_v33, 2 }
 0x3ab   : > { %v1352_v34 = vadd.f32 %v1351_v13, %v1350_v31  ;;  %v1359_v50 = vadd.f32 %v1358_v2, %v1357_v33 }
 0x3ad   : > { %v1353_v35 = vrot.slane %v1352_v34, 1  ;;  %v1360_v36 = vrot.slane %v1359_v50, 1 }
 0x3af   : > { %v1354_v37 = vadd.f32 %v1353_v35, %v1352_v34  ;;  %v1361_v24 = vadd.f32 %v1360_v36, %v1359_v50 }
 0x3b1   : > { %v1374_v14 = vadd.f32 %v1367_v21, %v1354_v37  ;;  %v1375_v38 = vadd.f32 %v1371_v26, %v1361_v24 }
 0x3b3   : > { %v1506_v39 = vmul.f32 -1.442695, %v1374_v14  ;;  %v1507_v40 = vmul.f32 -1.442695, %v1375_v38 }
 0x3b5   : > { %1547 = vpow2.f32 %v1506_v39 }
 0x3b6   : > { %1549 = vpow2.f32 %v1507_v40 }
 0x3c2   : > { %v1548_v41 = vpop.eup %1547 }
 0x3c3   : > { %v1550_v42 = vpop.eup %1549  ;;  %v1382_v44 = vadd.f32 1.0, %v1548_v41 }
 0x3c4   : > { %v1383_v46 = vadd.f32 1.0, %v1550_v42 }
 0x3c5   : > { %1551 = vrcp.f32 %v1382_v44 }
 0x3c6   : > { %1553 = vrcp.f32 %v1383_v46 }
 0x3d2   : > { %v1552_v32 = vpop.eup %1551 }
 0x3d3   : > { %v1554_v47 = vpop.eup %1553  ;;  %v1391_v52 = vrot.slane %v1552_v32, %v1813_v18 }
 0x3d4   : > { %v1395_v54 = vrot.slane %v1554_v47, %v1813_v18  ;;  %v1558_v18 = vld [vmem:[%s1745_s28 + $0x18] sm:$0xff] }
 0x3d5   : > { %v1396_v57 = vmul.f32 %v1391_v52, %v1876_v43  ;;  %v1398_v58 = vmul.f32 %v1391_v52, %v1878_v45 }
 0x3d6   : > { %v1397_v59 = vmul.f32 %v1395_v54, %v1880_v51  ;;  %v1399_v60 = vmul.f32 %v1395_v54, %v1884_v53 }
 0x3d7   : > { %v1400_v62 = vadd.f32 %v1555_v61, %v1396_v57  ;;  %v1402_v0 = vadd.f32 %v1556_v63, %v1398_v58 }
 0x3d8   : > { %v1401_v3 = vadd.f32 %v1557_v1, %v1397_v59  ;;  %v1403_v4 = vadd.f32 %v1558_v18, %v1399_v60 }
 0x3d9   : > { %1404 = vst [vmem:[%s362_s24] sm:$0xff] %v1400_v62  ;;  %1406 = vst [vmem:[%s362_s24 + $0x10] sm:$0xff] %v1402_v0 }
 0x3da   : > { %1405 = vst [vmem:[%s362_s24 + $0x8] sm:$0xff] %v1401_v3  ;;  %1407 = vst [vmem:[%s362_s24 + $0x18] sm:$0xff] %v1403_v4 }
 0x3db PF: > { %s21_s30 = sadd.s32 1, %s1625_s30  }
 0x3dc   : > { %p18_p3 = scmp.ge.s32.totalorder %s21_s30, 4  }
 0x3de   :  { %20 = sbr.rel (!%p18_p3) target bundleno = 2 (0x2), region = 95 }
 0x3e3   :  { %1429 = vsyncpa [#allocation3], 1 }
 0x3e4   :  { %1431 = vsyncpa [#allocation3 + $0x1], 1 }
 0x3e5   :  { %1432 = vsyncpa [#allocation5], 1 }

</bundles_post_ra>
